<compile_context>
chip_gen: v7x
topology: tpu7x:2x2x1
jax: 0.10.0
libtpu: 0.0.40
codegen_flags: <defaults>
</compile_context>

<pallas_src>
import functools
import math

import jax
import jax.numpy as jnp
from jax.experimental import pallas as pl
from jax.experimental.pallas import tpu as pltpu


def _round_up(x, m):
    return (x + m - 1) // m * m


def _cdiv(a, b):
    return (a + b - 1) // b


def _soft_hist_kernel(x_ref, y_ref, hd_ref, *, bins, vmin, delta, sigma,
                      hw, hw_tile, tiles_per_chunk, mask_tail):
    """Accumulate per-plane (unscaled) soft-histogram differences.

    x_ref, y_ref : (P, T) lane-dense pixel tiles for P image planes.
    hd_ref       : (P, 128) output/accumulator block; lane k (< bins) holds
                   (hist_x[k] - hist_y[k]) / (2*sinh(sigma*delta/2)) for that
                   plane, summed over the pixel tiles of this chunk.
    """
    t = pl.program_id(2)

    @pl.when(t == 0)
    def _init():
        hd_ref[...] = jnp.zeros_like(hd_ref)

    p_rows, tile = x_ref.shape

    # Hoist the sigma scaling out of the bins loop (d*sigma = x*sigma - c_k*sigma).
    sx = x_ref[...].astype(jnp.float32) * sigma            # (P, T)
    sy = y_ref[...].astype(jnp.float32) * sigma

    if mask_tail:
        # Pixel axis is not padded in HBM: the ragged tail tile (and any
        # logically out-of-range clamped tile of the last chunk) is neutralised
        # by forcing sx == sy there, so its per-bin contribution is exactly 0.
        tile_idx = pl.program_id(0) * tiles_per_chunk + t
        pix = tile_idx * hw_tile + jax.lax.broadcasted_iota(
            jnp.int32, (p_rows, tile), 1)
        valid = pix < hw
        sx = jnp.where(valid, sx, 0.0)
        sy = jnp.where(valid, sy, 0.0)

    # sigmoid(s(d+δ/2)) - sigmoid(s(d-δ/2)) == 2·sinh(c)·w / (1 + 2·cosh(c)·w + w²)
    # with w = exp(-|s·d|) (w <= 1, overflow-safe) and c = s·δ/2 a compile-time
    # constant.  For the x/y pair the two divisions fuse exactly into one and
    # the constant 2·sinh(c) factor is hoisted to the XLA epilogue:
    #   (k(x) - k(y)) / (2·sinh(c)) = (wx - wy)·(1 - wx·wy) / (den_x·den_y)
    # => 2 exp + 1 approx-reciprocal per (bin, pixel) instead of 4 sigmoids.
    c = sigma * delta * 0.5
    two_cosh_c = jnp.float32(2.0 * math.cosh(c))

    lanes = hd_ref.shape[1]
    lane_idx = jax.lax.broadcasted_iota(jnp.int32, (p_rows, lanes), 1)

    upd = jnp.zeros((p_rows, lanes), jnp.float32)
    for k in range(bins):                                  # bins is small: unroll
        ck = jnp.float32(sigma * (vmin + delta * (k + 0.5)))
        wx = jnp.exp(-jnp.abs(sx - ck))
        wy = jnp.exp(-jnp.abs(sy - ck))
        # Horner form: 3 VALU ops per denominator instead of 4.
        den = (((wx + two_cosh_c) * wx) + 1.0) * (((wy + two_cosh_c) * wy) + 1.0)
        num = (wx - wy) * (1.0 - wx * wy)
        # EUP approx reciprocal + one Newton step (r = r*(2 - den*r)) keeps the
        # result inside the rtol=1e-4 tolerance of the sigmoid reference.
        r = pl.reciprocal(den, approx=True)
        r = r * (2.0 - den * r)
        dk = jnp.sum(num * r, axis=1, keepdims=True)       # (P, 1)
        upd = upd + jnp.where(lane_idx == k, dk, 0.0)

    hd_ref[...] += upd


def soft_hist_loss(x, y, *, bins=10, vmin=0.0, vmax=1.0, sigma=3.0 * 50.0,
                   dis='l1'):
    """Pallas implementation of SoftHistLoss.forward(x, y).

    x, y: NCHW float arrays with C >= 3 (only the first 3 channels are used,
    matching the PyTorch reference which loops j in range(3)).
    """
    assert x.shape[0] == y.shape[0], 'batch_size are different'
    assert x.shape[1] >= 3 and y.shape[1] >= 3
    assert x.shape[2:] == y.shape[2:]
    B = x.shape[0]
    H, W = x.shape[2], x.shape[3]
    N = B * 3
    HW = H * W
    delta = float(vmax - vmin) / float(bins)

    P_ROWS = 8          # planes per grid step (sublane-aligned)
    LANES = 128         # output lane width (>= bins, one full lane tile)
    assert bins <= LANES, f'bins={bins} exceeds the {LANES}-lane histogram block'
    # sinh/cosh/exp of c = sigma*delta/2 must stay finite in f32 (default: 7.5).
    assert float(sigma) * delta * 0.5 < 88.0, 'sigma*delta/2 too large for f32'

    # Fixed lane-dense pixel tile (<= 16K f32 elements per 8-row block): keeps
    # per-step compute far above the ~0.35us grid-step overhead on every shape
    # and stays well inside the scoped VMEM defaults (v5e 16MiB, v6e/v7x 32MiB).
    HW_TILE = min(16384, _round_up(HW, 128))
    num_tiles = _cdiv(HW, HW_TILE)

    # Split the pixel reduction into parallel chunks of partial histograms so
    # v7x's second TensorCore has work even when N <= 8 planes (neutral on
    # single-TC v5e/v6e); partials are summed in the epilogue.
    NUM_CHUNKS = 2 if num_tiles >= 2 else 1
    tiles_per_chunk = _cdiv(num_tiles, NUM_CHUNKS)
    clamp_needed = (NUM_CHUNKS * tiles_per_chunk != num_tiles)
    mask_tail = (NUM_CHUNKS * tiles_per_chunk * HW_TILE != HW)

    # Flatten to lane-dense (N, HW) planes.  No astype (kernel casts on load)
    # and no pixel-axis padding (ragged tail handled in-kernel); only the cheap
    # row dimension is padded to a sublane multiple.  Padded rows are identical
    # (zero) in x and y, so their per-bin contributions cancel exactly.
    x3 = x[:, :3, :, :].reshape(N, HW)
    y3 = y[:, :3, :, :].reshape(N, HW)
    N_pad = _round_up(N, P_ROWS)
    if N_pad != N:
        x3 = jnp.pad(x3, ((0, N_pad - N), (0, 0)))
        y3 = jnp.pad(y3, ((0, N_pad - N), (0, 0)))
    row_blocks = N_pad // P_ROWS

    def in_index_map(c, r, t):
        tile = c * tiles_per_chunk + t
        if clamp_needed:
            # Logical tiles past the end re-read the last real tile; they are
            # fully masked inside the kernel so they contribute exactly zero.
            tile = jnp.minimum(tile, num_tiles - 1)
        return (r, tile)

    kernel = functools.partial(
        _soft_hist_kernel, bins=bins, vmin=float(vmin), delta=delta,
        sigma=float(sigma), hw=HW, hw_tile=HW_TILE,
        tiles_per_chunk=tiles_per_chunk, mask_tail=mask_tail)

    hist_diff = pl.pallas_call(
        kernel,
        out_shape=jax.ShapeDtypeStruct((NUM_CHUNKS * N_pad, LANES), jnp.float32),
        grid_spec=pltpu.PrefetchScalarGridSpec(
            num_scalar_prefetch=0,
            grid=(NUM_CHUNKS, row_blocks, tiles_per_chunk),
            in_specs=[
                pl.BlockSpec((P_ROWS, HW_TILE), in_index_map),
                pl.BlockSpec((P_ROWS, HW_TILE), in_index_map),
            ],
            out_specs=pl.BlockSpec((P_ROWS, LANES),
                                   lambda c, r, t: (c * row_blocks + r, 0)),
        ),
        compiler_params=pltpu.CompilerParams(
            dimension_semantics=("parallel", "parallel", "arbitrary")),
    )(x3, y3)

    # Tiny epilogue in XLA: sum chunk partials, apply the hoisted 2*sinh(c)
    # scale (squared for MSE), |.| or square, mean over bins, sum over planes.
    hd = hist_diff.reshape(NUM_CHUNKS, N_pad, LANES).sum(axis=0)[:N, :bins]
    two_sinh_c = 2.0 * math.sinh(float(sigma) * delta * 0.5)
    if dis == 'l1':
        per_plane = jnp.mean(jnp.abs(hd), axis=1) * two_sinh_c     # L1Loss
    else:
        per_plane = jnp.mean(hd * hd, axis=1) * (two_sinh_c * two_sinh_c)  # MSE
    return jnp.sum(per_plane) / B * 1e-4


def soft_hist_loss_ref(x, y, *, bins=10, vmin=0.0, vmax=1.0,
                       sigma=3.0 * 50.0, dis='l1'):
    """Pure-JAX reference, mirrors the PyTorch code."""
    B = x.shape[0]
    delta = float(vmax - vmin) / float(bins)
    centers = vmin + delta * (jnp.arange(bins, dtype=jnp.float32) + 0.5)
    running = 0.0
    for i in range(B):
        for j in range(3):
            a = x[i, j].reshape(-1)[None, :] - centers[:, None]
            a = (jax.nn.sigmoid(sigma * (a + delta / 2))
                 - jax.nn.sigmoid(sigma * (a - delta / 2))).sum(axis=1)
            b = y[i, j].reshape(-1)[None, :] - centers[:, None]
            b = (jax.nn.sigmoid(sigma * (b + delta / 2))
                 - jax.nn.sigmoid(sigma * (b - delta / 2))).sum(axis=1)
            if dis == 'l1':
                running = running + jnp.mean(jnp.abs(a - b))
            else:
                running = running + jnp.mean((a - b) ** 2)
    return running / B * 1e-4


if __name__ == "__main__":
    key = jax.random.PRNGKey(0)
    kx, ky = jax.random.split(key)
    B, C, H, W = 2, 4, 16, 16          # only the first 3 channels are used
    x = jax.random.uniform(kx, (B, C, H, W), dtype=jnp.float32)
    y = jax.random.uniform(ky, (B, C, H, W), dtype=jnp.float32)

    loss = jax.block_until_ready(jax.jit(soft_hist_loss)(x, y))
    ref = jax.block_until_ready(soft_hist_loss_ref(x, y))

    # rtol slightly relaxed vs the two-sigmoid reference because the kernel uses
    # the algebraically identical (but differently rounded) exp-based form with
    # an approx reciprocal + one Newton step.
    assert jnp.allclose(loss, ref, rtol=1e-4, atol=1e-7), (loss, ref)

    print("KERNEL_OK")
</pallas_src>

<mosaic_0001>
module attributes {stable_mosaic.version = 11 : i64} {
  func.func @_soft_hist_kernel(%arg0: i32, %arg1: i32, %arg2: i32, %arg3: memref<8x256xf32, #tpu.memory_space<vmem>>, %arg4: memref<8x256xf32, #tpu.memory_space<vmem>>, %arg5: memref<8x128xf32, #tpu.memory_space<vmem>>) attributes {dimension_semantics = [#tpu.dimension_semantics<parallel>, #tpu.dimension_semantics<parallel>, #tpu.dimension_semantics<arbitrary>], iteration_bounds = array<i64: 1, 1, 1>, scalar_prefetch = 0 : i64, scratch_operands = 0 : i64, tpu.core_type = #tpu.core_type<tc>, window_params = [{transform_indices = @transform_0, window_bounds = array<i64: 8, 256>}, {transform_indices = @transform_1, window_bounds = array<i64: 8, 256>}, {transform_indices = @transform_2, window_bounds = array<i64: 8, 128>}]} {
    %c0_i32 = arith.constant 0 : i32
    %0 = arith.cmpi eq, %arg2, %c0_i32 : i32
    %1 = arith.extui %0 : i1 to i32
    %c0_i32_0 = arith.constant 0 : i32
    %2 = arith.cmpi ne, %1, %c0_i32_0 : i32
    scf.if %2 {
      %cst_131 = arith.constant 0.000000e+00 : f32
      %444 = vector.broadcast %cst_131 : f32 to vector<8x128xf32>
      %c0_132 = arith.constant 0 : index
      %c0_133 = arith.constant 0 : index
      %445 = vector.load %arg5[%c0_132, %c0_133] : memref<8x128xf32, #tpu.memory_space<vmem>>, vector<8x128xf32>
      tpu.vector_store %arg5[%c0_132, %c0_133], %444 {strides = array<i32>} : memref<8x128xf32, #tpu.memory_space<vmem>>, vector<8x128xf32>,
    } else {
    }
    %c0 = arith.constant 0 : index
    %c0_1 = arith.constant 0 : index
    %3 = vector.load %arg3[%c0, %c0_1] : memref<8x256xf32, #tpu.memory_space<vmem>>, vector<8x256xf32>
    %cst = arith.constant 1.500000e+02 : f32
    %4 = vector.broadcast %cst : f32 to vector<8x256xf32>
    %5 = arith.mulf %3, %4 : vector<8x256xf32>
    %c0_2 = arith.constant 0 : index
    %c0_3 = arith.constant 0 : index
    %6 = vector.load %arg4[%c0_2, %c0_3] : memref<8x256xf32, #tpu.memory_space<vmem>>, vector<8x256xf32>
    %cst_4 = arith.constant 1.500000e+02 : f32
    %7 = vector.broadcast %cst_4 : f32 to vector<8x256xf32>
    %8 = arith.mulf %6, %7 : vector<8x256xf32>
    %9 = tpu.iota {dimensions = array<i32: 1>} : vector<8x128xi32>
    %cst_5 = arith.constant 0.000000e+00 : f32
    %10 = vector.broadcast %cst_5 : f32 to vector<8x128xf32>
    %cst_6 = arith.constant 7.500000e+00 : f32
    %11 = vector.broadcast %cst_6 : f32 to vector<8x256xf32>
    %12 = arith.subf %5, %11 : vector<8x256xf32>
    %13 = math.absf %12 : vector<8x256xf32>
    %cst_7 = arith.constant 0.000000e+00 : f32
    %14 = vector.broadcast %cst_7 : f32 to vector<8x256xf32>
    %15 = arith.subf %14, %13 : vector<8x256xf32>
    %16 = math.exp %15 : vector<8x256xf32>
    %cst_8 = arith.constant 7.500000e+00 : f32
    %17 = vector.broadcast %cst_8 : f32 to vector<8x256xf32>
    %18 = arith.subf %8, %17 : vector<8x256xf32>
    %19 = math.absf %18 : vector<8x256xf32>
    %cst_9 = arith.constant 0.000000e+00 : f32
    %20 = vector.broadcast %cst_9 : f32 to vector<8x256xf32>
    %21 = arith.subf %20, %19 : vector<8x256xf32>
    %22 = math.exp %21 : vector<8x256xf32>
    %cst_10 = arith.constant 1808.04297 : f32
    %23 = vector.broadcast %cst_10 : f32 to vector<8x256xf32>
    %24 = arith.addf %16, %23 : vector<8x256xf32>
    %25 = arith.mulf %24, %16 : vector<8x256xf32>
    %cst_11 = arith.constant 1.000000e+00 : f32
    %26 = vector.broadcast %cst_11 : f32 to vector<8x256xf32>
    %27 = arith.addf %25, %26 : vector<8x256xf32>
    %cst_12 = arith.constant 1808.04297 : f32
    %28 = vector.broadcast %cst_12 : f32 to vector<8x256xf32>
    %29 = arith.addf %22, %28 : vector<8x256xf32>
    %30 = arith.mulf %29, %22 : vector<8x256xf32>
    %cst_13 = arith.constant 1.000000e+00 : f32
    %31 = vector.broadcast %cst_13 : f32 to vector<8x256xf32>
    %32 = arith.addf %30, %31 : vector<8x256xf32>
    %33 = arith.mulf %27, %32 : vector<8x256xf32>
    %34 = arith.subf %16, %22 : vector<8x256xf32>
    %35 = arith.mulf %16, %22 : vector<8x256xf32>
    %cst_14 = arith.constant 1.000000e+00 : f32
    %36 = vector.broadcast %cst_14 : f32 to vector<8x256xf32>
    %37 = arith.subf %36, %35 : vector<8x256xf32>
    %38 = arith.mulf %34, %37 : vector<8x256xf32>
    %39 = tpu.reciprocal %33 {approx = true} : vector<8x256xf32> -> vector<8x256xf32>
    %40 = arith.mulf %33, %39 : vector<8x256xf32>
    %cst_15 = arith.constant 2.000000e+00 : f32
    %41 = vector.broadcast %cst_15 : f32 to vector<8x256xf32>
    %42 = arith.subf %41, %40 : vector<8x256xf32>
    %43 = arith.mulf %39, %42 : vector<8x256xf32>
    %44 = arith.mulf %38, %43 : vector<8x256xf32>
    %cst_16 = arith.constant dense<0.000000e+00> : vector<8xf32>
    %45 = vector.multi_reduction <add>, %44, %cst_16 [1] : vector<8x256xf32> to vector<8xf32>
    %46 = vector.shape_cast %45 : vector<8xf32> to vector<8x1xf32>
    %c0_i32_17 = arith.constant 0 : i32
    %47 = vector.broadcast %c0_i32_17 : i32 to vector<8x128xi32>
    %48 = arith.cmpi eq, %9, %47 : vector<8x128xi32>
    %cst_18 = arith.constant 0.000000e+00 : f32
    %49 = vector.shape_cast %46 : vector<8x1xf32> to vector<8x1xf32>
    %50 = vector.broadcast %49 : vector<8x1xf32> to vector<8x128xf32>
    %51 = vector.broadcast %cst_18 : f32 to vector<8x128xf32>
    %52 = arith.select %48, %50, %51 : vector<8x128xi1>, vector<8x128xf32>
    %53 = arith.addf %10, %52 : vector<8x128xf32>
    %cst_19 = arith.constant 2.250000e+01 : f32
    %54 = vector.broadcast %cst_19 : f32 to vector<8x256xf32>
    %55 = arith.subf %5, %54 : vector<8x256xf32>
    %56 = math.absf %55 : vector<8x256xf32>
    %cst_20 = arith.constant 0.000000e+00 : f32
    %57 = vector.broadcast %cst_20 : f32 to vector<8x256xf32>
    %58 = arith.subf %57, %56 : vector<8x256xf32>
    %59 = math.exp %58 : vector<8x256xf32>
    %cst_21 = arith.constant 2.250000e+01 : f32
    %60 = vector.broadcast %cst_21 : f32 to vector<8x256xf32>
    %61 = arith.subf %8, %60 : vector<8x256xf32>
    %62 = math.absf %61 : vector<8x256xf32>
    %cst_22 = arith.constant 0.000000e+00 : f32
    %63 = vector.broadcast %cst_22 : f32 to vector<8x256xf32>
    %64 = arith.subf %63, %62 : vector<8x256xf32>
    %65 = math.exp %64 : vector<8x256xf32>
    %cst_23 = arith.constant 1808.04297 : f32
    %66 = vector.broadcast %cst_23 : f32 to vector<8x256xf32>
    %67 = arith.addf %59, %66 : vector<8x256xf32>
    %68 = arith.mulf %67, %59 : vector<8x256xf32>
    %cst_24 = arith.constant 1.000000e+00 : f32
    %69 = vector.broadcast %cst_24 : f32 to vector<8x256xf32>
    %70 = arith.addf %68, %69 : vector<8x256xf32>
    %cst_25 = arith.constant 1808.04297 : f32
    %71 = vector.broadcast %cst_25 : f32 to vector<8x256xf32>
    %72 = arith.addf %65, %71 : vector<8x256xf32>
    %73 = arith.mulf %72, %65 : vector<8x256xf32>
    %cst_26 = arith.constant 1.000000e+00 : f32
    %74 = vector.broadcast %cst_26 : f32 to vector<8x256xf32>
    %75 = arith.addf %73, %74 : vector<8x256xf32>
    %76 = arith.mulf %70, %75 : vector<8x256xf32>
    %77 = arith.subf %59, %65 : vector<8x256xf32>
    %78 = arith.mulf %59, %65 : vector<8x256xf32>
    %cst_27 = arith.constant 1.000000e+00 : f32
    %79 = vector.broadcast %cst_27 : f32 to vector<8x256xf32>
    %80 = arith.subf %79, %78 : vector<8x256xf32>
    %81 = arith.mulf %77, %80 : vector<8x256xf32>
    %82 = tpu.reciprocal %76 {approx = true} : vector<8x256xf32> -> vector<8x256xf32>
    %83 = arith.mulf %76, %82 : vector<8x256xf32>
    %cst_28 = arith.constant 2.000000e+00 : f32
    %84 = vector.broadcast %cst_28 : f32 to vector<8x256xf32>
    %85 = arith.subf %84, %83 : vector<8x256xf32>
    %86 = arith.mulf %82, %85 : vector<8x256xf32>
    %87 = arith.mulf %81, %86 : vector<8x256xf32>
    %cst_29 = arith.constant dense<0.000000e+00> : vector<8xf32>
    %88 = vector.multi_reduction <add>, %87, %cst_29 [1] : vector<8x256xf32> to vector<8xf32>
    %89 = vector.shape_cast %88 : vector<8xf32> to vector<8x1xf32>
    %c1_i32 = arith.constant 1 : i32
    %90 = vector.broadcast %c1_i32 : i32 to vector<8x128xi32>
    %91 = arith.cmpi eq, %9, %90 : vector<8x128xi32>
    %cst_30 = arith.constant 0.000000e+00 : f32
    %92 = vector.shape_cast %89 : vector<8x1xf32> to vector<8x1xf32>
    %93 = vector.broadcast %92 : vector<8x1xf32> to vector<8x128xf32>
    %94 = vector.broadcast %cst_30 : f32 to vector<8x128xf32>
    %95 = arith.select %91, %93, %94 : vector<8x128xi1>, vector<8x128xf32>
    %96 = arith.addf %53, %95 : vector<8x128xf32>
    %cst_31 = arith.constant 3.750000e+01 : f32
    %97 = vector.broadcast %cst_31 : f32 to vector<8x256xf32>
    %98 = arith.subf %5, %97 : vector<8x256xf32>
    %99 = math.absf %98 : vector<8x256xf32>
    %cst_32 = arith.constant 0.000000e+00 : f32
    %100 = vector.broadcast %cst_32 : f32 to vector<8x256xf32>
    %101 = arith.subf %100, %99 : vector<8x256xf32>
    %102 = math.exp %101 : vector<8x256xf32>
    %cst_33 = arith.constant 3.750000e+01 : f32
    %103 = vector.broadcast %cst_33 : f32 to vector<8x256xf32>
    %104 = arith.subf %8, %103 : vector<8x256xf32>
    %105 = math.absf %104 : vector<8x256xf32>
    %cst_34 = arith.constant 0.000000e+00 : f32
    %106 = vector.broadcast %cst_34 : f32 to vector<8x256xf32>
    %107 = arith.subf %106, %105 : vector<8x256xf32>
    %108 = math.exp %107 : vector<8x256xf32>
    %cst_35 = arith.constant 1808.04297 : f32
    %109 = vector.broadcast %cst_35 : f32 to vector<8x256xf32>
    %110 = arith.addf %102, %109 : vector<8x256xf32>
    %111 = arith.mulf %110, %102 : vector<8x256xf32>
    %cst_36 = arith.constant 1.000000e+00 : f32
    %112 = vector.broadcast %cst_36 : f32 to vector<8x256xf32>
    %113 = arith.addf %111, %112 : vector<8x256xf32>
    %cst_37 = arith.constant 1808.04297 : f32
    %114 = vector.broadcast %cst_37 : f32 to vector<8x256xf32>
    %115 = arith.addf %108, %114 : vector<8x256xf32>
    %116 = arith.mulf %115, %108 : vector<8x256xf32>
    %cst_38 = arith.constant 1.000000e+00 : f32
    %117 = vector.broadcast %cst_38 : f32 to vector<8x256xf32>
    %118 = arith.addf %116, %117 : vector<8x256xf32>
    %119 = arith.mulf %113, %118 : vector<8x256xf32>
    %120 = arith.subf %102, %108 : vector<8x256xf32>
    %121 = arith.mulf %102, %108 : vector<8x256xf32>
    %cst_39 = arith.constant 1.000000e+00 : f32
    %122 = vector.broadcast %cst_39 : f32 to vector<8x256xf32>
    %123 = arith.subf %122, %121 : vector<8x256xf32>
    %124 = arith.mulf %120, %123 : vector<8x256xf32>
    %125 = tpu.reciprocal %119 {approx = true} : vector<8x256xf32> -> vector<8x256xf32>
    %126 = arith.mulf %119, %125 : vector<8x256xf32>
    %cst_40 = arith.constant 2.000000e+00 : f32
    %127 = vector.broadcast %cst_40 : f32 to vector<8x256xf32>
    %128 = arith.subf %127, %126 : vector<8x256xf32>
    %129 = arith.mulf %125, %128 : vector<8x256xf32>
    %130 = arith.mulf %124, %129 : vector<8x256xf32>
    %cst_41 = arith.constant dense<0.000000e+00> : vector<8xf32>
    %131 = vector.multi_reduction <add>, %130, %cst_41 [1] : vector<8x256xf32> to vector<8xf32>
    %132 = vector.shape_cast %131 : vector<8xf32> to vector<8x1xf32>
    %c2_i32 = arith.constant 2 : i32
    %133 = vector.broadcast %c2_i32 : i32 to vector<8x128xi32>
    %134 = arith.cmpi eq, %9, %133 : vector<8x128xi32>
    %cst_42 = arith.constant 0.000000e+00 : f32
    %135 = vector.shape_cast %132 : vector<8x1xf32> to vector<8x1xf32>
    %136 = vector.broadcast %135 : vector<8x1xf32> to vector<8x128xf32>
    %137 = vector.broadcast %cst_42 : f32 to vector<8x128xf32>
    %138 = arith.select %134, %136, %137 : vector<8x128xi1>, vector<8x128xf32>
    %139 = arith.addf %96, %138 : vector<8x128xf32>
    %cst_43 = arith.constant 5.250000e+01 : f32
    %140 = vector.broadcast %cst_43 : f32 to vector<8x256xf32>
    %141 = arith.subf %5, %140 : vector<8x256xf32>
    %142 = math.absf %141 : vector<8x256xf32>
    %cst_44 = arith.constant 0.000000e+00 : f32
    %143 = vector.broadcast %cst_44 : f32 to vector<8x256xf32>
    %144 = arith.subf %143, %142 : vector<8x256xf32>
    %145 = math.exp %144 : vector<8x256xf32>
    %cst_45 = arith.constant 5.250000e+01 : f32
    %146 = vector.broadcast %cst_45 : f32 to vector<8x256xf32>
    %147 = arith.subf %8, %146 : vector<8x256xf32>
    %148 = math.absf %147 : vector<8x256xf32>
    %cst_46 = arith.constant 0.000000e+00 : f32
    %149 = vector.broadcast %cst_46 : f32 to vector<8x256xf32>
    %150 = arith.subf %149, %148 : vector<8x256xf32>
    %151 = math.exp %150 : vector<8x256xf32>
    %cst_47 = arith.constant 1808.04297 : f32
    %152 = vector.broadcast %cst_47 : f32 to vector<8x256xf32>
    %153 = arith.addf %145, %152 : vector<8x256xf32>
    %154 = arith.mulf %153, %145 : vector<8x256xf32>
    %cst_48 = arith.constant 1.000000e+00 : f32
    %155 = vector.broadcast %cst_48 : f32 to vector<8x256xf32>
    %156 = arith.addf %154, %155 : vector<8x256xf32>
    %cst_49 = arith.constant 1808.04297 : f32
    %157 = vector.broadcast %cst_49 : f32 to vector<8x256xf32>
    %158 = arith.addf %151, %157 : vector<8x256xf32>
    %159 = arith.mulf %158, %151 : vector<8x256xf32>
    %cst_50 = arith.constant 1.000000e+00 : f32
    %160 = vector.broadcast %cst_50 : f32 to vector<8x256xf32>
    %161 = arith.addf %159, %160 : vector<8x256xf32>
    %162 = arith.mulf %156, %161 : vector<8x256xf32>
    %163 = arith.subf %145, %151 : vector<8x256xf32>
    %164 = arith.mulf %145, %151 : vector<8x256xf32>
    %cst_51 = arith.constant 1.000000e+00 : f32
    %165 = vector.broadcast %cst_51 : f32 to vector<8x256xf32>
    %166 = arith.subf %165, %164 : vector<8x256xf32>
    %167 = arith.mulf %163, %166 : vector<8x256xf32>
    %168 = tpu.reciprocal %162 {approx = true} : vector<8x256xf32> -> vector<8x256xf32>
    %169 = arith.mulf %162, %168 : vector<8x256xf32>
    %cst_52 = arith.constant 2.000000e+00 : f32
    %170 = vector.broadcast %cst_52 : f32 to vector<8x256xf32>
    %171 = arith.subf %170, %169 : vector<8x256xf32>
    %172 = arith.mulf %168, %171 : vector<8x256xf32>
    %173 = arith.mulf %167, %172 : vector<8x256xf32>
    %cst_53 = arith.constant dense<0.000000e+00> : vector<8xf32>
    %174 = vector.multi_reduction <add>, %173, %cst_53 [1] : vector<8x256xf32> to vector<8xf32>
    %175 = vector.shape_cast %174 : vector<8xf32> to vector<8x1xf32>
    %c3_i32 = arith.constant 3 : i32
    %176 = vector.broadcast %c3_i32 : i32 to vector<8x128xi32>
    %177 = arith.cmpi eq, %9, %176 : vector<8x128xi32>
    %cst_54 = arith.constant 0.000000e+00 : f32
    %178 = vector.shape_cast %175 : vector<8x1xf32> to vector<8x1xf32>
    %179 = vector.broadcast %178 : vector<8x1xf32> to vector<8x128xf32>
    %180 = vector.broadcast %cst_54 : f32 to vector<8x128xf32>
    %181 = arith.select %177, %179, %180 : vector<8x128xi1>, vector<8x128xf32>
    %182 = arith.addf %139, %181 : vector<8x128xf32>
    %cst_55 = arith.constant 6.750000e+01 : f32
    %183 = vector.broadcast %cst_55 : f32 to vector<8x256xf32>
    %184 = arith.subf %5, %183 : vector<8x256xf32>
    %185 = math.absf %184 : vector<8x256xf32>
    %cst_56 = arith.constant 0.000000e+00 : f32
    %186 = vector.broadcast %cst_56 : f32 to vector<8x256xf32>
    %187 = arith.subf %186, %185 : vector<8x256xf32>
    %188 = math.exp %187 : vector<8x256xf32>
    %cst_57 = arith.constant 6.750000e+01 : f32
    %189 = vector.broadcast %cst_57 : f32 to vector<8x256xf32>
    %190 = arith.subf %8, %189 : vector<8x256xf32>
    %191 = math.absf %190 : vector<8x256xf32>
    %cst_58 = arith.constant 0.000000e+00 : f32
    %192 = vector.broadcast %cst_58 : f32 to vector<8x256xf32>
    %193 = arith.subf %192, %191 : vector<8x256xf32>
    %194 = math.exp %193 : vector<8x256xf32>
    %cst_59 = arith.constant 1808.04297 : f32
    %195 = vector.broadcast %cst_59 : f32 to vector<8x256xf32>
    %196 = arith.addf %188, %195 : vector<8x256xf32>
    %197 = arith.mulf %196, %188 : vector<8x256xf32>
    %cst_60 = arith.constant 1.000000e+00 : f32
    %198 = vector.broadcast %cst_60 : f32 to vector<8x256xf32>
    %199 = arith.addf %197, %198 : vector<8x256xf32>
    %cst_61 = arith.constant 1808.04297 : f32
    %200 = vector.broadcast %cst_61 : f32 to vector<8x256xf32>
    %201 = arith.addf %194, %200 : vector<8x256xf32>
    %202 = arith.mulf %201, %194 : vector<8x256xf32>
    %cst_62 = arith.constant 1.000000e+00 : f32
    %203 = vector.broadcast %cst_62 : f32 to vector<8x256xf32>
    %204 = arith.addf %202, %203 : vector<8x256xf32>
    %205 = arith.mulf %199, %204 : vector<8x256xf32>
    %206 = arith.subf %188, %194 : vector<8x256xf32>
    %207 = arith.mulf %188, %194 : vector<8x256xf32>
    %cst_63 = arith.constant 1.000000e+00 : f32
    %208 = vector.broadcast %cst_63 : f32 to vector<8x256xf32>
    %209 = arith.subf %208, %207 : vector<8x256xf32>
    %210 = arith.mulf %206, %209 : vector<8x256xf32>
    %211 = tpu.reciprocal %205 {approx = true} : vector<8x256xf32> -> vector<8x256xf32>
    %212 = arith.mulf %205, %211 : vector<8x256xf32>
    %cst_64 = arith.constant 2.000000e+00 : f32
    %213 = vector.broadcast %cst_64 : f32 to vector<8x256xf32>
    %214 = arith.subf %213, %212 : vector<8x256xf32>
    %215 = arith.mulf %211, %214 : vector<8x256xf32>
    %216 = arith.mulf %210, %215 : vector<8x256xf32>
    %cst_65 = arith.constant dense<0.000000e+00> : vector<8xf32>
    %217 = vector.multi_reduction <add>, %216, %cst_65 [1] : vector<8x256xf32> to vector<8xf32>
    %218 = vector.shape_cast %217 : vector<8xf32> to vector<8x1xf32>
    %c4_i32 = arith.constant 4 : i32
    %219 = vector.broadcast %c4_i32 : i32 to vector<8x128xi32>
    %220 = arith.cmpi eq, %9, %219 : vector<8x128xi32>
    %cst_66 = arith.constant 0.000000e+00 : f32
    %221 = vector.shape_cast %218 : vector<8x1xf32> to vector<8x1xf32>
    %222 = vector.broadcast %221 : vector<8x1xf32> to vector<8x128xf32>
    %223 = vector.broadcast %cst_66 : f32 to vector<8x128xf32>
    %224 = arith.select %220, %222, %223 : vector<8x128xi1>, vector<8x128xf32>
    %225 = arith.addf %182, %224 : vector<8x128xf32>
    %cst_67 = arith.constant 8.250000e+01 : f32
    %226 = vector.broadcast %cst_67 : f32 to vector<8x256xf32>
    %227 = arith.subf %5, %226 : vector<8x256xf32>
    %228 = math.absf %227 : vector<8x256xf32>
    %cst_68 = arith.constant 0.000000e+00 : f32
    %229 = vector.broadcast %cst_68 : f32 to vector<8x256xf32>
    %230 = arith.subf %229, %228 : vector<8x256xf32>
    %231 = math.exp %230 : vector<8x256xf32>
    %cst_69 = arith.constant 8.250000e+01 : f32
    %232 = vector.broadcast %cst_69 : f32 to vector<8x256xf32>
    %233 = arith.subf %8, %232 : vector<8x256xf32>
    %234 = math.absf %233 : vector<8x256xf32>
    %cst_70 = arith.constant 0.000000e+00 : f32
    %235 = vector.broadcast %cst_70 : f32 to vector<8x256xf32>
    %236 = arith.subf %235, %234 : vector<8x256xf32>
    %237 = math.exp %236 : vector<8x256xf32>
    %cst_71 = arith.constant 1808.04297 : f32
    %238 = vector.broadcast %cst_71 : f32 to vector<8x256xf32>
    %239 = arith.addf %231, %238 : vector<8x256xf32>
    %240 = arith.mulf %239, %231 : vector<8x256xf32>
    %cst_72 = arith.constant 1.000000e+00 : f32
    %241 = vector.broadcast %cst_72 : f32 to vector<8x256xf32>
    %242 = arith.addf %240, %241 : vector<8x256xf32>
    %cst_73 = arith.constant 1808.04297 : f32
    %243 = vector.broadcast %cst_73 : f32 to vector<8x256xf32>
    %244 = arith.addf %237, %243 : vector<8x256xf32>
    %245 = arith.mulf %244, %237 : vector<8x256xf32>
    %cst_74 = arith.constant 1.000000e+00 : f32
    %246 = vector.broadcast %cst_74 : f32 to vector<8x256xf32>
    %247 = arith.addf %245, %246 : vector<8x256xf32>
    %248 = arith.mulf %242, %247 : vector<8x256xf32>
    %249 = arith.subf %231, %237 : vector<8x256xf32>
    %250 = arith.mulf %231, %237 : vector<8x256xf32>
    %cst_75 = arith.constant 1.000000e+00 : f32
    %251 = vector.broadcast %cst_75 : f32 to vector<8x256xf32>
    %252 = arith.subf %251, %250 : vector<8x256xf32>
    %253 = arith.mulf %249, %252 : vector<8x256xf32>
    %254 = tpu.reciprocal %248 {approx = true} : vector<8x256xf32> -> vector<8x256xf32>
    %255 = arith.mulf %248, %254 : vector<8x256xf32>
    %cst_76 = arith.constant 2.000000e+00 : f32
    %256 = vector.broadcast %cst_76 : f32 to vector<8x256xf32>
    %257 = arith.subf %256, %255 : vector<8x256xf32>
    %258 = arith.mulf %254, %257 : vector<8x256xf32>
    %259 = arith.mulf %253, %258 : vector<8x256xf32>
    %cst_77 = arith.constant dense<0.000000e+00> : vector<8xf32>
    %260 = vector.multi_reduction <add>, %259, %cst_77 [1] : vector<8x256xf32> to vector<8xf32>
    %261 = vector.shape_cast %260 : vector<8xf32> to vector<8x1xf32>
    %c5_i32 = arith.constant 5 : i32
    %262 = vector.broadcast %c5_i32 : i32 to vector<8x128xi32>
    %263 = arith.cmpi eq, %9, %262 : vector<8x128xi32>
    %cst_78 = arith.constant 0.000000e+00 : f32
    %264 = vector.shape_cast %261 : vector<8x1xf32> to vector<8x1xf32>
    %265 = vector.broadcast %264 : vector<8x1xf32> to vector<8x128xf32>
    %266 = vector.broadcast %cst_78 : f32 to vector<8x128xf32>
    %267 = arith.select %263, %265, %266 : vector<8x128xi1>, vector<8x128xf32>
    %268 = arith.addf %225, %267 : vector<8x128xf32>
    %cst_79 = arith.constant 9.750000e+01 : f32
    %269 = vector.broadcast %cst_79 : f32 to vector<8x256xf32>
    %270 = arith.subf %5, %269 : vector<8x256xf32>
    %271 = math.absf %270 : vector<8x256xf32>
    %cst_80 = arith.constant 0.000000e+00 : f32
    %272 = vector.broadcast %cst_80 : f32 to vector<8x256xf32>
    %273 = arith.subf %272, %271 : vector<8x256xf32>
    %274 = math.exp %273 : vector<8x256xf32>
    %cst_81 = arith.constant 9.750000e+01 : f32
    %275 = vector.broadcast %cst_81 : f32 to vector<8x256xf32>
    %276 = arith.subf %8, %275 : vector<8x256xf32>
    %277 = math.absf %276 : vector<8x256xf32>
    %cst_82 = arith.constant 0.000000e+00 : f32
    %278 = vector.broadcast %cst_82 : f32 to vector<8x256xf32>
    %279 = arith.subf %278, %277 : vector<8x256xf32>
    %280 = math.exp %279 : vector<8x256xf32>
    %cst_83 = arith.constant 1808.04297 : f32
    %281 = vector.broadcast %cst_83 : f32 to vector<8x256xf32>
    %282 = arith.addf %274, %281 : vector<8x256xf32>
    %283 = arith.mulf %282, %274 : vector<8x256xf32>
    %cst_84 = arith.constant 1.000000e+00 : f32
    %284 = vector.broadcast %cst_84 : f32 to vector<8x256xf32>
    %285 = arith.addf %283, %284 : vector<8x256xf32>
    %cst_85 = arith.constant 1808.04297 : f32
    %286 = vector.broadcast %cst_85 : f32 to vector<8x256xf32>
    %287 = arith.addf %280, %286 : vector<8x256xf32>
    %288 = arith.mulf %287, %280 : vector<8x256xf32>
    %cst_86 = arith.constant 1.000000e+00 : f32
    %289 = vector.broadcast %cst_86 : f32 to vector<8x256xf32>
    %290 = arith.addf %288, %289 : vector<8x256xf32>
    %291 = arith.mulf %285, %290 : vector<8x256xf32>
    %292 = arith.subf %274, %280 : vector<8x256xf32>
    %293 = arith.mulf %274, %280 : vector<8x256xf32>
    %cst_87 = arith.constant 1.000000e+00 : f32
    %294 = vector.broadcast %cst_87 : f32 to vector<8x256xf32>
    %295 = arith.subf %294, %293 : vector<8x256xf32>
    %296 = arith.mulf %292, %295 : vector<8x256xf32>
    %297 = tpu.reciprocal %291 {approx = true} : vector<8x256xf32> -> vector<8x256xf32>
    %298 = arith.mulf %291, %297 : vector<8x256xf32>
    %cst_88 = arith.constant 2.000000e+00 : f32
    %299 = vector.broadcast %cst_88 : f32 to vector<8x256xf32>
    %300 = arith.subf %299, %298 : vector<8x256xf32>
    %301 = arith.mulf %297, %300 : vector<8x256xf32>
    %302 = arith.mulf %296, %301 : vector<8x256xf32>
    %cst_89 = arith.constant dense<0.000000e+00> : vector<8xf32>
    %303 = vector.multi_reduction <add>, %302, %cst_89 [1] : vector<8x256xf32> to vector<8xf32>
    %304 = vector.shape_cast %303 : vector<8xf32> to vector<8x1xf32>
    %c6_i32 = arith.constant 6 : i32
    %305 = vector.broadcast %c6_i32 : i32 to vector<8x128xi32>
    %306 = arith.cmpi eq, %9, %305 : vector<8x128xi32>
    %cst_90 = arith.constant 0.000000e+00 : f32
    %307 = vector.shape_cast %304 : vector<8x1xf32> to vector<8x1xf32>
    %308 = vector.broadcast %307 : vector<8x1xf32> to vector<8x128xf32>
    %309 = vector.broadcast %cst_90 : f32 to vector<8x128xf32>
    %310 = arith.select %306, %308, %309 : vector<8x128xi1>, vector<8x128xf32>
    %311 = arith.addf %268, %310 : vector<8x128xf32>
    %cst_91 = arith.constant 1.125000e+02 : f32
    %312 = vector.broadcast %cst_91 : f32 to vector<8x256xf32>
    %313 = arith.subf %5, %312 : vector<8x256xf32>
    %314 = math.absf %313 : vector<8x256xf32>
    %cst_92 = arith.constant 0.000000e+00 : f32
    %315 = vector.broadcast %cst_92 : f32 to vector<8x256xf32>
    %316 = arith.subf %315, %314 : vector<8x256xf32>
    %317 = math.exp %316 : vector<8x256xf32>
    %cst_93 = arith.constant 1.125000e+02 : f32
    %318 = vector.broadcast %cst_93 : f32 to vector<8x256xf32>
    %319 = arith.subf %8, %318 : vector<8x256xf32>
    %320 = math.absf %319 : vector<8x256xf32>
    %cst_94 = arith.constant 0.000000e+00 : f32
    %321 = vector.broadcast %cst_94 : f32 to vector<8x256xf32>
    %322 = arith.subf %321, %320 : vector<8x256xf32>
    %323 = math.exp %322 : vector<8x256xf32>
    %cst_95 = arith.constant 1808.04297 : f32
    %324 = vector.broadcast %cst_95 : f32 to vector<8x256xf32>
    %325 = arith.addf %317, %324 : vector<8x256xf32>
    %326 = arith.mulf %325, %317 : vector<8x256xf32>
    %cst_96 = arith.constant 1.000000e+00 : f32
    %327 = vector.broadcast %cst_96 : f32 to vector<8x256xf32>
    %328 = arith.addf %326, %327 : vector<8x256xf32>
    %cst_97 = arith.constant 1808.04297 : f32
    %329 = vector.broadcast %cst_97 : f32 to vector<8x256xf32>
    %330 = arith.addf %323, %329 : vector<8x256xf32>
    %331 = arith.mulf %330, %323 : vector<8x256xf32>
    %cst_98 = arith.constant 1.000000e+00 : f32
    %332 = vector.broadcast %cst_98 : f32 to vector<8x256xf32>
    %333 = arith.addf %331, %332 : vector<8x256xf32>
    %334 = arith.mulf %328, %333 : vector<8x256xf32>
    %335 = arith.subf %317, %323 : vector<8x256xf32>
    %336 = arith.mulf %317, %323 : vector<8x256xf32>
    %cst_99 = arith.constant 1.000000e+00 : f32
    %337 = vector.broadcast %cst_99 : f32 to vector<8x256xf32>
    %338 = arith.subf %337, %336 : vector<8x256xf32>
    %339 = arith.mulf %335, %338 : vector<8x256xf32>
    %340 = tpu.reciprocal %334 {approx = true} : vector<8x256xf32> -> vector<8x256xf32>
    %341 = arith.mulf %334, %340 : vector<8x256xf32>
    %cst_100 = arith.constant 2.000000e+00 : f32
    %342 = vector.broadcast %cst_100 : f32 to vector<8x256xf32>
    %343 = arith.subf %342, %341 : vector<8x256xf32>
    %344 = arith.mulf %340, %343 : vector<8x256xf32>
    %345 = arith.mulf %339, %344 : vector<8x256xf32>
    %cst_101 = arith.constant dense<0.000000e+00> : vector<8xf32>
    %346 = vector.multi_reduction <add>, %345, %cst_101 [1] : vector<8x256xf32> to vector<8xf32>
    %347 = vector.shape_cast %346 : vector<8xf32> to vector<8x1xf32>
    %c7_i32 = arith.constant 7 : i32
    %348 = vector.broadcast %c7_i32 : i32 to vector<8x128xi32>
    %349 = arith.cmpi eq, %9, %348 : vector<8x128xi32>
    %cst_102 = arith.constant 0.000000e+00 : f32
    %350 = vector.shape_cast %347 : vector<8x1xf32> to vector<8x1xf32>
    %351 = vector.broadcast %350 : vector<8x1xf32> to vector<8x128xf32>
    %352 = vector.broadcast %cst_102 : f32 to vector<8x128xf32>
    %353 = arith.select %349, %351, %352 : vector<8x128xi1>, vector<8x128xf32>
    %354 = arith.addf %311, %353 : vector<8x128xf32>
    %cst_103 = arith.constant 1.275000e+02 : f32
    %355 = vector.broadcast %cst_103 : f32 to vector<8x256xf32>
    %356 = arith.subf %5, %355 : vector<8x256xf32>
    %357 = math.absf %356 : vector<8x256xf32>
    %cst_104 = arith.constant 0.000000e+00 : f32
    %358 = vector.broadcast %cst_104 : f32 to vector<8x256xf32>
    %359 = arith.subf %358, %357 : vector<8x256xf32>
    %360 = math.exp %359 : vector<8x256xf32>
    %cst_105 = arith.constant 1.275000e+02 : f32
    %361 = vector.broadcast %cst_105 : f32 to vector<8x256xf32>
    %362 = arith.subf %8, %361 : vector<8x256xf32>
    %363 = math.absf %362 : vector<8x256xf32>
    %cst_106 = arith.constant 0.000000e+00 : f32
    %364 = vector.broadcast %cst_106 : f32 to vector<8x256xf32>
    %365 = arith.subf %364, %363 : vector<8x256xf32>
    %366 = math.exp %365 : vector<8x256xf32>
    %cst_107 = arith.constant 1808.04297 : f32
    %367 = vector.broadcast %cst_107 : f32 to vector<8x256xf32>
    %368 = arith.addf %360, %367 : vector<8x256xf32>
    %369 = arith.mulf %368, %360 : vector<8x256xf32>
    %cst_108 = arith.constant 1.000000e+00 : f32
    %370 = vector.broadcast %cst_108 : f32 to vector<8x256xf32>
    %371 = arith.addf %369, %370 : vector<8x256xf32>
    %cst_109 = arith.constant 1808.04297 : f32
    %372 = vector.broadcast %cst_109 : f32 to vector<8x256xf32>
    %373 = arith.addf %366, %372 : vector<8x256xf32>
    %374 = arith.mulf %373, %366 : vector<8x256xf32>
    %cst_110 = arith.constant 1.000000e+00 : f32
    %375 = vector.broadcast %cst_110 : f32 to vector<8x256xf32>
    %376 = arith.addf %374, %375 : vector<8x256xf32>
    %377 = arith.mulf %371, %376 : vector<8x256xf32>
    %378 = arith.subf %360, %366 : vector<8x256xf32>
    %379 = arith.mulf %360, %366 : vector<8x256xf32>
    %cst_111 = arith.constant 1.000000e+00 : f32
    %380 = vector.broadcast %cst_111 : f32 to vector<8x256xf32>
    %381 = arith.subf %380, %379 : vector<8x256xf32>
    %382 = arith.mulf %378, %381 : vector<8x256xf32>
    %383 = tpu.reciprocal %377 {approx = true} : vector<8x256xf32> -> vector<8x256xf32>
    %384 = arith.mulf %377, %383 : vector<8x256xf32>
    %cst_112 = arith.constant 2.000000e+00 : f32
    %385 = vector.broadcast %cst_112 : f32 to vector<8x256xf32>
    %386 = arith.subf %385, %384 : vector<8x256xf32>
    %387 = arith.mulf %383, %386 : vector<8x256xf32>
    %388 = arith.mulf %382, %387 : vector<8x256xf32>
    %cst_113 = arith.constant dense<0.000000e+00> : vector<8xf32>
    %389 = vector.multi_reduction <add>, %388, %cst_113 [1] : vector<8x256xf32> to vector<8xf32>
    %390 = vector.shape_cast %389 : vector<8xf32> to vector<8x1xf32>
    %c8_i32 = arith.constant 8 : i32
    %391 = vector.broadcast %c8_i32 : i32 to vector<8x128xi32>
    %392 = arith.cmpi eq, %9, %391 : vector<8x128xi32>
    %cst_114 = arith.constant 0.000000e+00 : f32
    %393 = vector.shape_cast %390 : vector<8x1xf32> to vector<8x1xf32>
    %394 = vector.broadcast %393 : vector<8x1xf32> to vector<8x128xf32>
    %395 = vector.broadcast %cst_114 : f32 to vector<8x128xf32>
    %396 = arith.select %392, %394, %395 : vector<8x128xi1>, vector<8x128xf32>
    %397 = arith.addf %354, %396 : vector<8x128xf32>
    %cst_115 = arith.constant 1.425000e+02 : f32
    %398 = vector.broadcast %cst_115 : f32 to vector<8x256xf32>
    %399 = arith.subf %5, %398 : vector<8x256xf32>
    %400 = math.absf %399 : vector<8x256xf32>
    %cst_116 = arith.constant 0.000000e+00 : f32
    %401 = vector.broadcast %cst_116 : f32 to vector<8x256xf32>
    %402 = arith.subf %401, %400 : vector<8x256xf32>
    %403 = math.exp %402 : vector<8x256xf32>
    %cst_117 = arith.constant 1.425000e+02 : f32
    %404 = vector.broadcast %cst_117 : f32 to vector<8x256xf32>
    %405 = arith.subf %8, %404 : vector<8x256xf32>
    %406 = math.absf %405 : vector<8x256xf32>
    %cst_118 = arith.constant 0.000000e+00 : f32
    %407 = vector.broadcast %cst_118 : f32 to vector<8x256xf32>
    %408 = arith.subf %407, %406 : vector<8x256xf32>
    %409 = math.exp %408 : vector<8x256xf32>
    %cst_119 = arith.constant 1808.04297 : f32
    %410 = vector.broadcast %cst_119 : f32 to vector<8x256xf32>
    %411 = arith.addf %403, %410 : vector<8x256xf32>
    %412 = arith.mulf %411, %403 : vector<8x256xf32>
    %cst_120 = arith.constant 1.000000e+00 : f32
    %413 = vector.broadcast %cst_120 : f32 to vector<8x256xf32>
    %414 = arith.addf %412, %413 : vector<8x256xf32>
    %cst_121 = arith.constant 1808.04297 : f32
    %415 = vector.broadcast %cst_121 : f32 to vector<8x256xf32>
    %416 = arith.addf %409, %415 : vector<8x256xf32>
    %417 = arith.mulf %416, %409 : vector<8x256xf32>
    %cst_122 = arith.constant 1.000000e+00 : f32
    %418 = vector.broadcast %cst_122 : f32 to vector<8x256xf32>
    %419 = arith.addf %417, %418 : vector<8x256xf32>
    %420 = arith.mulf %414, %419 : vector<8x256xf32>
    %421 = arith.subf %403, %409 : vector<8x256xf32>
    %422 = arith.mulf %403, %409 : vector<8x256xf32>
    %cst_123 = arith.constant 1.000000e+00 : f32
    %423 = vector.broadcast %cst_123 : f32 to vector<8x256xf32>
    %424 = arith.subf %423, %422 : vector<8x256xf32>
    %425 = arith.mulf %421, %424 : vector<8x256xf32>
    %426 = tpu.reciprocal %420 {approx = true} : vector<8x256xf32> -> vector<8x256xf32>
    %427 = arith.mulf %420, %426 : vector<8x256xf32>
    %cst_124 = arith.constant 2.000000e+00 : f32
    %428 = vector.broadcast %cst_124 : f32 to vector<8x256xf32>
    %429 = arith.subf %428, %427 : vector<8x256xf32>
    %430 = arith.mulf %426, %429 : vector<8x256xf32>
    %431 = arith.mulf %425, %430 : vector<8x256xf32>
    %cst_125 = arith.constant dense<0.000000e+00> : vector<8xf32>
    %432 = vector.multi_reduction <add>, %431, %cst_125 [1] : vector<8x256xf32> to vector<8xf32>
    %433 = vector.shape_cast %432 : vector<8xf32> to vector<8x1xf32>
    %c9_i32 = arith.constant 9 : i32
    %434 = vector.broadcast %c9_i32 : i32 to vector<8x128xi32>
    %435 = arith.cmpi eq, %9, %434 : vector<8x128xi32>
    %cst_126 = arith.constant 0.000000e+00 : f32
    %436 = vector.shape_cast %433 : vector<8x1xf32> to vector<8x1xf32>
    %437 = vector.broadcast %436 : vector<8x1xf32> to vector<8x128xf32>
    %438 = vector.broadcast %cst_126 : f32 to vector<8x128xf32>
    %439 = arith.select %435, %437, %438 : vector<8x128xi1>, vector<8x128xf32>
    %440 = arith.addf %397, %439 : vector<8x128xf32>
    %c0_127 = arith.constant 0 : index
    %c0_128 = arith.constant 0 : index
    %441 = vector.load %arg5[%c0_127, %c0_128] : memref<8x128xf32, #tpu.memory_space<vmem>>, vector<8x128xf32>
    %442 = arith.addf %441, %440 : vector<8x128xf32>
    %c0_129 = arith.constant 0 : index
    %c0_130 = arith.constant 0 : index
    %443 = vector.load %arg5[%c0_129, %c0_130] : memref<8x128xf32, #tpu.memory_space<vmem>>, vector<8x128xf32>
    tpu.vector_store %arg5[%c0_129, %c0_130], %442 {strides = array<i32>} : memref<8x128xf32, #tpu.memory_space<vmem>>, vector<8x128xf32>,
    return
  }
  func.func @transform_0(%arg0: i32, %arg1: i32, %arg2: i32) -> (i32, i32) {
    %c1_i32 = arith.constant 1 : i32
    %0 = arith.muli %arg0, %c1_i32 : i32
    %1 = arith.addi %0, %arg2 : i32
    %c0_i32 = arith.constant 0 : i32
    return %arg1, %1 : i32, i32
  }
  func.func @transform_1(%arg0: i32, %arg1: i32, %arg2: i32) -> (i32, i32) {
    %c1_i32 = arith.constant 1 : i32
    %0 = arith.muli %arg0, %c1_i32 : i32
    %1 = arith.addi %0, %arg2 : i32
    %c0_i32 = arith.constant 0 : i32
    return %arg1, %1 : i32, i32
  }
  func.func @transform_2(%arg0: i32, %arg1: i32, %arg2: i32) -> (i32, i32) {
    %c1_i32 = arith.constant 1 : i32
    %0 = arith.muli %arg0, %c1_i32 : i32
    %1 = arith.addi %0, %arg1 : i32
    %c0_i32 = arith.constant 0 : i32
    %c0_i32_0 = arith.constant 0 : i32
    return %1, %c0_i32 : i32, i32
  }
}

</mosaic_0001>

<bundles_post_ra>
// kernel: soft_hist_loss.1
= control target key start
LH: loop header
LB: loop body
LE: loop exit
PB: predicated region body
PF: predicated region fallthrough
CT: control target
= control target key end

     0   :  { %s1134_s0 = inlined_call_operand.vmem [shape: f32[8,256], index: 0, kind: input, shape index: {}]   ;;  %s1135_s1 = inlined_call_operand.vmem [shape: f32[8,256], index: 1, kind: input, shape index: {}]   ;;  %s1136_s2 = inlined_call_operand.vmem [shape: f32[8,128], index: 2, kind: output, shape index: {}]  }
   0x1   :  { %v71_v0 = vld [vmem:[%s1134_s0] sm:$0xff]  ;;  %v72_v1 = vld [vmem:[%s1134_s0 + $0x8] sm:$0xff] }
   0x2   :  { %v75_v2 = vld [vmem:[%s1135_s1] sm:$0xff]  ;;  %v884_v3 = vmul.f32 150.0, %v71_v0  ;;  %v886_v4 = vmul.f32 150.0, %v72_v1  ;;  %v76_v5 = vld [vmem:[%s1135_s1 + $0x8] sm:$0xff] }
   0x3   :  { %v891_v6 = vmul.f32 150.0, %v75_v2  ;;  %v893_v7 = vmul.f32 150.0, %v76_v5 }
   0x4   :  { %v699_v8 = vadd.f32 -7.5, %v884_v3  ;;  %v700_v9 = vadd.f32 -7.5, %v886_v4  ;;  %v707_v11 = vadd.f32 -37.5, %v884_v3  ;;  %v708_v13 = vadd.f32 -37.5, %v886_v4 }
   0x5   :  { %v701_v10 = vadd.f32 -7.5, %v891_v6  ;;  %v702_v12 = vadd.f32 -7.5, %v893_v7  ;;  %v709_v14 = vadd.f32 -37.5, %v891_v6  ;;  %v710_v15 = vadd.f32 -37.5, %v893_v7 }
   0x6   :  { %v83_v16 = vand.u32 2147483647, %v699_v8  ;;  %v84_v17 = vand.u32 2147483647, %v700_v9  ;;  %v199_v20 = vand.u32 2147483647, %v707_v11 }
   0x7   :  { %v93_v18 = vand.u32 2147483647, %v701_v10  ;;  %v94_v19 = vand.u32 2147483647, %v702_v12  ;;  %v200_v21 = vand.u32 2147483647, %v708_v13 }
   0x8   :  { %v85_v22 = vsub.f32 0.0, %v83_v16  ;;  %v86_v23 = vsub.f32 0.0, %v84_v17  ;;  %v209_v25 = vand.u32 2147483647, %v709_v14  ;;  %v201_v27 = vsub.f32 0.0, %v199_v20 }
   0x9   :  { %v95_v24 = vsub.f32 0.0, %v93_v18  ;;  %v96_v26 = vsub.f32 0.0, %v94_v19  ;;  %v202_v28 = vsub.f32 0.0, %v200_v21  ;;  %v210_v29 = vand.u32 2147483647, %v710_v15 }
   0xa   :  { %v87_v30 = vmul.f32 1.442695, %v85_v22  ;;  %v89_v31 = vmul.f32 1.442695, %v86_v23  ;;  %v203_v34 = vmul.f32 1.442695, %v201_v27 }
   0xb   :  { %v97_v32 = vmul.f32 1.442695, %v95_v24  ;;  %v99_v33 = vmul.f32 1.442695, %v96_v26  ;;  %v205_v35 = vmul.f32 1.442695, %v202_v28 }
   0xc   :  { %740 = vpow2.f32 %v87_v30  ;;  %v211_v36 = vsub.f32 0.0, %v209_v25  ;;  %v212_v37 = vsub.f32 0.0, %v210_v29  ;;  %v703_v38 = vadd.f32 -22.5, %v884_v3 }
   0xd   :  { %742 = vpow2.f32 %v89_v31  ;;  %v704_v39 = vadd.f32 -22.5, %v886_v4  ;;  %v705_v40 = vadd.f32 -22.5, %v891_v6  ;;  %v706_v41 = vadd.f32 -22.5, %v893_v7 }
   0xe   :  { %744 = vpow2.f32 %v97_v32  ;;  %v213_v42 = vmul.f32 1.442695, %v211_v36  ;;  %v215_v43 = vmul.f32 1.442695, %v212_v37  ;;  %v141_v44 = vand.u32 2147483647, %v703_v38 }
   0xf   :  { %746 = vpow2.f32 %v99_v33  ;;  %v142_v45 = vand.u32 2147483647, %v704_v39  ;;  %v151_v46 = vand.u32 2147483647, %v705_v40  ;;  %v152_v47 = vand.u32 2147483647, %v706_v41 }
  0x10   :  { %748 = vpow2.f32 %v203_v34  ;;  %v143_v48 = vsub.f32 0.0, %v141_v44  ;;  %v711_v49 = vadd.f32 -52.5, %v884_v3  ;;  %v712_v50 = vadd.f32 -52.5, %v886_v4 }
  0x11   :  { %750 = vpow2.f32 %v205_v35  ;;  %v144_v51 = vsub.f32 0.0, %v142_v45  ;;  %v153_v52 = vsub.f32 0.0, %v151_v46  ;;  %v154_v53 = vsub.f32 0.0, %v152_v47 }
  0x12   :  { %752 = vpow2.f32 %v213_v42  ;;  %v145_v54 = vmul.f32 1.442695, %v143_v48  ;;  %v257_v55 = vand.u32 2147483647, %v711_v49  ;;  %v258_v56 = vand.u32 2147483647, %v712_v50 }
  0x13   :  { %754 = vpow2.f32 %v215_v43  ;;  %v147_v57 = vmul.f32 1.442695, %v144_v51  ;;  %v155_v58 = vmul.f32 1.442695, %v153_v52  ;;  %v157_v59 = vmul.f32 1.442695, %v154_v53 }
  0x14   :  { %756 = vpow2.f32 %v145_v54  ;;  %v259_v60 = vsub.f32 0.0, %v257_v55  ;;  %v260_v61 = vsub.f32 0.0, %v258_v56  ;;  %v713_v62 = vadd.f32 -52.5, %v891_v6 }
  0x15   :  { %758 = vpow2.f32 %v147_v57  ;;  %v911_v63 = vadd.f32 -52.5, %v893_v7  ;;  %v914_v0 = vadd.f32 -67.5, %v884_v3  ;;  %v917_v5 = vadd.f32 -67.5, %v886_v4 }
  0x16   :  { %v741_v1 = vpop.eup %740  ;;  %760 = vpow2.f32 %v155_v58  ;;  %v261_v2 = vmul.f32 1.442695, %v259_v60  ;;  %v919_v10 = vmul.f32 1.442695, %v260_v61  ;;  %v267_v11 = vand.u32 2147483647, %v713_v62 }
  0x17   :  { %v743_v8 = vpop.eup %742  ;;  %v101_v9 = vadd.f32 1808.043, %v741_v1  ;;  %762 = vpow2.f32 %v157_v59  ;;  %v268_v14 = vand.u32 2147483647, %v911_v63  ;;  %v315_v15 = vand.u32 2147483647, %v914_v0 }
  0x18   :  { %v745_v12 = vpop.eup %744  ;;  %v102_v13 = vadd.f32 1808.043, %v743_v8  ;;  %764 = vpow2.f32 %v261_v2  ;;  %v269_v40 = vsub.f32 0.0, %v267_v11  ;;  %v316_v45 = vand.u32 2147483647, %v917_v5 }
  0x19   :  { %v747_v16 = vpop.eup %746  ;;  %v103_v17 = vmul.f32 %v741_v1, %v101_v9  ;;  %v107_v18 = vadd.f32 1808.043, %v745_v12  ;;  %v115_v19 = vsub.f32 %v741_v1, %v745_v12  ;;  %v117_v20 = vmul.f32 %v745_v12, %v741_v1 }
  0x1a   :  { %v749_v21 = vpop.eup %748  ;;  %v104_v22 = vmul.f32 %v743_v8, %v102_v13  ;;  %v108_v23 = vadd.f32 1808.043, %v747_v16  ;;  %v116_v24 = vsub.f32 %v743_v8, %v747_v16  ;;  %v118_v25 = vmul.f32 %v747_v16, %v743_v8 }
  0x1b   :  { %v923_v26 = vpop.eup %750  ;;  %v105_v27 = vadd.f32 1.0, %v103_v17  ;;  %v109_v28 = vmul.f32 %v745_v12, %v107_v18  ;;  %v119_v29 = vsub.f32 1.0, %v117_v20  ;;  %v217_v30 = vadd.f32 1808.043, %v749_v21 }
  0x1c   :  { %v753_v31 = vpop.eup %752  ;;  %v106_v32 = vadd.f32 1.0, %v104_v22  ;;  %v110_v33 = vmul.f32 %v747_v16, %v108_v23  ;;  %v120_v34 = vsub.f32 1.0, %v118_v25  ;;  %v218_v35 = vadd.f32 1808.043, %v923_v26 }
  0x1d   :  { %v755_v36 = vpop.eup %754  ;;  %v111_v37 = vadd.f32 1.0, %v109_v28  ;;  %v219_v38 = vmul.f32 %v749_v21, %v217_v30  ;;  %v223_v39 = vadd.f32 1808.043, %v753_v31  ;;  %v932_v48 = vmul.f32 %v119_v29, %v115_v19 }
  0x1e   :  { %v926_v41 = vpop.eup %756  ;;  %v112_v42 = vadd.f32 1.0, %v110_v33  ;;  %v220_v43 = vmul.f32 %v923_v26, %v218_v35  ;;  %v224_v44 = vadd.f32 1808.043, %v755_v36  ;;  %v934_v53 = vmul.f32 %v120_v34, %v116_v24 }
  0x1f   :  { %v930_v46 = vpop.eup %758  ;;  %v113_v47 = vmul.f32 %v111_v37, %v105_v27  ;;  %v221_v49 = vadd.f32 1.0, %v219_v38  ;;  %v225_v50 = vmul.f32 %v753_v31, %v223_v39  ;;  %v233_v58 = vmul.f32 %v753_v31, %v749_v21 }
  0x20   :  { %v761_v51 = vpop.eup %760  ;;  %v114_v52 = vmul.f32 %v112_v42, %v106_v32  ;;  %v222_v54 = vadd.f32 1.0, %v220_v43  ;;  %v226_v55 = vmul.f32 %v755_v36, %v224_v44  ;;  %v234_v59 = vmul.f32 %v755_v36, %v923_v26 }
  0x21   :  { %v936_v56 = vpop.eup %762  ;;  %766 = vrcp.f32 %v113_v47  ;;  %v227_v57 = vadd.f32 1.0, %v225_v50  ;;  %v159_v62 = vadd.f32 1808.043, %v926_v41  ;;  %v160_v1 = vadd.f32 1808.043, %v930_v46 }
  0x22   :  { %v939_v60 = vpop.eup %764  ;;  %768 = vrcp.f32 %v114_v52  ;;  %v228_v61 = vadd.f32 1.0, %v226_v55  ;;  %v231_v5 = vsub.f32 %v749_v21, %v753_v31  ;;  %v235_v8 = vsub.f32 1.0, %v233_v58 }
  0x23   :  { %v229_v2 = vmul.f32 %v227_v57, %v221_v49  ;;  %v165_v9 = vadd.f32 1808.043, %v761_v51  ;;  %v161_v12 = vmul.f32 %v926_v41, %v159_v62  ;;  %v162_v13 = vmul.f32 %v930_v46, %v160_v1 }
  0x24   :  { %v230_v11 = vmul.f32 %v228_v61, %v222_v54  ;;  %v166_v16 = vadd.f32 1808.043, %v936_v56  ;;  %v232_v17 = vsub.f32 %v923_v26, %v755_v36  ;;  %v236_v18 = vsub.f32 1.0, %v234_v59 }
  0x25   :  { %770 = vrcp.f32 %v229_v2  ;;  %v167_v19 = vmul.f32 %v761_v51, %v165_v9  ;;  %v163_v20 = vadd.f32 1.0, %v161_v12  ;;  %v164_v22 = vadd.f32 1.0, %v162_v13 }
  0x26   :  { %772 = vrcp.f32 %v230_v11  ;;  %v168_v23 = vmul.f32 %v936_v56, %v166_v16  ;;  %v948_v21 = vmul.f32 %v235_v8, %v231_v5  ;;  %v173_v25 = vsub.f32 %v926_v41, %v761_v51 }
  0x27   :  { %v169_v24 = vadd.f32 1.0, %v167_v19  ;;  %v175_v27 = vmul.f32 %v761_v51, %v926_v41  ;;  %v176_v29 = vmul.f32 %v936_v56, %v930_v46  ;;  %774 = vpow2.f32 %v919_v10 }
  0x28   :  { %v170_v28 = vadd.f32 1.0, %v168_v23  ;;  %v270_v26 = vsub.f32 0.0, %v268_v14  ;;  %v271_v32 = vmul.f32 1.442695, %v269_v40  ;;  %v275_v33 = vadd.f32 1808.043, %v939_v60 }
  0x29   :  { %v171_v30 = vmul.f32 %v169_v24, %v163_v20  ;;  %v177_v31 = vsub.f32 1.0, %v175_v27  ;;  %v238_v34 = vmul.f32 %v236_v18, %v232_v17  ;;  %v317_v37 = vsub.f32 0.0, %v315_v15 }
  0x2a   :  { %v172_v35 = vmul.f32 %v170_v28, %v164_v22  ;;  %v273_v36 = vmul.f32 1.442695, %v270_v26  ;;  %v174_v39 = vsub.f32 %v930_v46, %v936_v56  ;;  %v178_v41 = vsub.f32 1.0, %v176_v29 }
  0x2b   :  { %v767_v38 = vpop.eup %766  ;;  %776 = vrcp.f32 %v171_v30  ;;  %v318_v10 = vsub.f32 0.0, %v316_v45  ;;  %v962_v42 = vmul.f32 %v177_v31, %v173_v25  ;;  %v319_v40 = vmul.f32 1.442695, %v317_v37 }
  0x2c   :  { %v769_v63 = vpop.eup %768  ;;  %v125_v14 = vmul.f32 %v767_v38, %v113_v47  ;;  %778 = vrcp.f32 %v172_v35  ;;  %v277_v44 = vmul.f32 %v939_v60, %v275_v33  ;;  %v717_v15 = vadd.f32 -67.5, %v891_v6 }
  0x2d   :  { %v126_v43 = vmul.f32 %v769_v63, %v114_v52  ;;  %780 = vpow2.f32 %v271_v32  ;;  %v321_v49 = vmul.f32 1.442695, %v318_v10  ;;  %v718_v46 = vadd.f32 -67.5, %v893_v7 }
  0x2e   :  { %v127_v0 = vsub.f32 2.0, %v125_v14  ;;  %782 = vpow2.f32 %v273_v36  ;;  %v719_v45 = vadd.f32 -82.5, %v884_v3  ;;  %v720_v47 = vadd.f32 -82.5, %v886_v4 }
  0x2f   :  { %v771_v50 = vpop.eup %770  ;;  %v128_v51 = vsub.f32 2.0, %v126_v43  ;;  %784 = vpow2.f32 %v319_v40  ;;  %v325_v56 = vand.u32 2147483647, %v717_v15  ;;  %v326_v59 = vand.u32 2147483647, %v718_v46 }
  0x30   :  { %v773_v54 = vpop.eup %772  ;;  %v129_v55 = vmul.f32 %v767_v38, %v127_v0  ;;  %v241_v52 = vmul.f32 %v771_v50, %v229_v2  ;;  %786 = vpow2.f32 %v321_v49  ;;  %v373_v61 = vand.u32 2147483647, %v719_v45 }
  0x31   :  { %v130_v57 = vmul.f32 %v769_v63, %v128_v51  ;;  %v242_v58 = vmul.f32 %v773_v54, %v230_v11  ;;  %v969_v62 = vpop.eup %774  ;;  %v327_v8 = vsub.f32 0.0, %v325_v56  ;;  %v374_v9 = vand.u32 2147483647, %v720_v47 }
  0x32   :  { %v131_v1 = vmul.f32 %v129_v55, %v932_v48  ;;  %v243_v5 = vsub.f32 2.0, %v241_v52  ;;  %v276_v16 = vadd.f32 1808.043, %v969_v62  ;;  %v328_v17 = vsub.f32 0.0, %v326_v59 }
  0x33   :  { %v132_v12 = vmul.f32 %v130_v57, %v934_v53  ;;  %v244_v13 = vsub.f32 2.0, %v242_v58  ;;  %v180_v18 = vmul.f32 %v178_v41, %v174_v39  ;;  %v329_v19 = vmul.f32 1.442695, %v327_v8 }
  0x34   :  { %v245_v2 = vmul.f32 %v771_v50, %v243_v5  ;;  %v375_v20 = vsub.f32 0.0, %v373_v61  ;;  %v278_v24 = vmul.f32 %v969_v62, %v276_v16  ;;  %v331_v25 = vmul.f32 1.442695, %v328_v17 }
  0x35   :  { %v777_v11 = vpop.eup %776  ;;  %v133_v22 = vadd.f32 %v132_v12, %v131_v1  ;;  %v246_v23 = vmul.f32 %v773_v54, %v244_v13  ;;  %v279_v29 = vadd.f32 1.0, %v277_v44  ;;  %788 = vpow2.f32 %v329_v19 }
  0x36   :  { %v779_v48 = vpop.eup %778  ;;  %v247_v27 = vmul.f32 %v245_v2, %v948_v21  ;;  %v183_v28 = vmul.f32 %v777_v11, %v171_v30  ;;  %790 = vpow2.f32 %v331_v25  ;;  %v376_v32 = vsub.f32 0.0, %v374_v9 }
  0x37   :  { %v781_v53 = vpop.eup %780  ;;  %134 = vadd.xlane.f32.xlu0 %v133_v22  ;;  %v248_v26 = vmul.f32 %v246_v23, %v238_v34  ;;  %v184_v31 = vmul.f32 %v779_v48, %v172_v35  ;;  %v377_v39 = vmul.f32 1.442695, %v375_v20  ;;  %v280_v21 = vadd.f32 1.0, %v278_v24 }
  0x38   :  { %v783_v33 = vpop.eup %782  ;;  %v185_v36 = vsub.f32 2.0, %v183_v28  ;;  %v281_v37 = vadd.f32 1808.043, %v781_v53  ;;  %v291_v38 = vmul.f32 %v781_v53, %v939_v60  ;;  %v289_v34 = vsub.f32 %v939_v60, %v781_v53 }
  0x39   :  { %v977_v41 = vpop.eup %784  ;;  %v249_v10 = vadd.f32 %v248_v26, %v247_v27  ;;  %v186_v63 = vsub.f32 2.0, %v184_v31  ;;  %v282_v30 = vadd.f32 1808.043, %v783_v33  ;;  %v292_v35 = vmul.f32 %v783_v33, %v969_v62 }
  0x3a   :  { %v979_v14 = vpop.eup %786  ;;  %v187_v40 = vmul.f32 %v777_v11, %v185_v36  ;;  %v283_v43 = vmul.f32 %v781_v53, %v281_v37  ;;  %v333_v0 = vadd.f32 1808.043, %v977_v41  ;;  %v290_v51 = vsub.f32 %v969_v62, %v783_v33 }
  0x3b   :  { %250 = vadd.xlane.f32.xlu1 %v249_v10  ;;  %v188_v44 = vmul.f32 %v779_v48, %v186_v63  ;;  %v284_v49 = vmul.f32 %v783_v33, %v282_v30  ;;  %v334_v15 = vadd.f32 1808.043, %v979_v14  ;;  %v293_v45 = vsub.f32 1.0, %v291_v38 }
  0x3c   :  { %v189_v46 = vmul.f32 %v187_v40, %v962_v42  ;;  %v285_v50 = vadd.f32 1.0, %v283_v43  ;;  %v294_v55 = vsub.f32 1.0, %v292_v35  ;;  %v335_v60 = vmul.f32 %v977_v41, %v333_v0 }
  0x3d   :  { %v190_v47 = vmul.f32 %v188_v44, %v180_v18  ;;  %v286_v54 = vadd.f32 1.0, %v284_v49  ;;  %v336_v56 = vmul.f32 %v979_v14, %v334_v15  ;;  %792 = vpow2.f32 %v377_v39 }
  0x3e   :  { %v287_v52 = vmul.f32 %v285_v50, %v279_v29  ;;  %v379_v57 = vmul.f32 1.442695, %v376_v32  ;;  %v721_v42 = vadd.f32 -82.5, %v891_v6  ;;  %v722_v62 = vadd.f32 -82.5, %v893_v7 }
  0x3f   :  { %v191_v58 = vadd.f32 %v190_v47, %v189_v46  ;;  %v288_v59 = vmul.f32 %v286_v54, %v280_v21  ;;  %v989_v61 = vpop.eup %788  ;;  %v723_v1 = vadd.f32 -97.5, %v884_v3  ;;  %v996_v8 = vmul.f32 %v293_v45, %v289_v34 }
  0x40   :  { %794 = vrcp.f32 %v287_v52  ;;  %v994_v5 = vpop.eup %790  ;;  %v998_v9 = vmul.f32 %v294_v55, %v290_v51  ;;  %v339_v12 = vadd.f32 1808.043, %v989_v61  ;;  %v337_v13 = vadd.f32 1.0, %v335_v60 }
  0x41   :  { %192 = vadd.xlane.f32.xlu0 %v191_v58  ;;  %796 = vrcp.f32 %v288_v59  ;;  %v338_v16 = vadd.f32 1.0, %v336_v56  ;;  %v340_v17 = vadd.f32 1808.043, %v994_v5  ;;  %v1005_v18 = vmul.f32 %v989_v61, %v977_v41 }
  0x42   :  { %798 = vpow2.f32 %v379_v57  ;;  %v341_v2 = vmul.f32 %v989_v61, %v339_v12  ;;  %v383_v19 = vand.u32 2147483647, %v721_v42  ;;  %v384_v20 = vand.u32 2147483647, %v722_v62 }
  0x43   :  { %v342_v11 = vmul.f32 %v994_v5, %v340_v17  ;;  %v347_v22 = vsub.f32 %v977_v41, %v989_v61  ;;  %v724_v23 = vadd.f32 -97.5, %v886_v4  ;;  %v431_v24 = vand.u32 2147483647, %v723_v1 }
  0x44   :  { %v343_v25 = vadd.f32 1.0, %v341_v2  ;;  %v348_v48 = vsub.f32 %v979_v14, %v994_v5  ;;  %v385_v27 = vsub.f32 0.0, %v383_v19  ;;  %v386_v28 = vsub.f32 0.0, %v384_v20 }
  0x45   :  { %v344_v29 = vadd.f32 1.0, %v342_v11  ;;  %v350_v53 = vmul.f32 %v994_v5, %v979_v14  ;;  %v432_v26 = vand.u32 2147483647, %v724_v23  ;;  %v433_v31 = vsub.f32 0.0, %v431_v24 }
  0x46   :  { %v345_v32 = vmul.f32 %v343_v25, %v337_v13  ;;  %v351_v33 = vsub.f32 1.0, %v1005_v18  ;;  %v387_v36 = vmul.f32 1.442695, %v385_v27  ;;  %v725_v37 = vadd.f32 -97.5, %v891_v6 }
  0x47   :  { %v1017_v38 = vpop.eup %792  ;;  %v346_v39 = vmul.f32 %v344_v29, %v338_v16  ;;  %v389_v10 = vmul.f32 1.442695, %v386_v28  ;;  %v434_v63 = vsub.f32 0.0, %v432_v26  ;;  %v726_v21 = vadd.f32 -97.5, %v893_v7 }
  0x48   :  { %800 = vrcp.f32 %v345_v32  ;;  %v435_v30 = vmul.f32 1.442695, %v433_v31  ;;  %v441_v40 = vand.u32 2147483647, %v725_v37  ;;  %v727_v43 = vadd.f32 -112.5, %v884_v3 }
  0x49   :  { %802 = vrcp.f32 %v346_v39  ;;  %v391_v35 = vadd.f32 1808.043, %v1017_v38  ;;  %v437_v44 = vmul.f32 1.442695, %v434_v63  ;;  %v442_v49 = vand.u32 2147483647, %v726_v21 }
  0x4a   :  { %v795_v34 = vpop.eup %794  ;;  %804 = vpow2.f32 %v387_v36  ;;  %v443_v46 = vsub.f32 0.0, %v441_v40  ;;  %v728_v50 = vadd.f32 -112.5, %v886_v4  ;;  %v489_v54 = vand.u32 2147483647, %v727_v43 }
  0x4b   :  { %v797_v0 = vpop.eup %796  ;;  %v299_v15 = vmul.f32 %v795_v34, %v287_v52  ;;  %806 = vpow2.f32 %v389_v10  ;;  %v444_v47 = vsub.f32 0.0, %v442_v49  ;;  %v352_v60 = vsub.f32 1.0, %v350_v53 }
  0x4c   :  { %v1023_v51 = vpop.eup %798  ;;  %v300_v45 = vmul.f32 %v797_v0, %v288_v59  ;;  %808 = vpow2.f32 %v435_v30  ;;  %v445_v58 = vmul.f32 1.442695, %v443_v46  ;;  %v393_v62 = vmul.f32 %v1017_v38, %v391_v35 }
  0x4d   :  { %v301_v55 = vsub.f32 2.0, %v299_v15  ;;  %v392_v56 = vadd.f32 1808.043, %v1023_v51  ;;  %810 = vpow2.f32 %v437_v44  ;;  %v447_v42 = vmul.f32 1.442695, %v444_v47 }
  0x4e   :  { %v302_v57 = vsub.f32 2.0, %v300_v45  ;;  %v490_v1 = vand.u32 2147483647, %v728_v50  ;;  %v491_v12 = vsub.f32 0.0, %v489_v54  ;;  %812 = vpow2.f32 %v445_v58 }
  0x4f   :  { %v303_v52 = vmul.f32 %v795_v34, %v301_v55  ;;  %v729_v59 = vadd.f32 -112.5, %v891_v6  ;;  %v730_v16 = vadd.f32 -112.5, %v893_v7  ;;  %v394_v2 = vmul.f32 %v1023_v51, %v392_v56 }
  0x50   :  { %v304_v13 = vmul.f32 %v797_v0, %v302_v57  ;;  %814 = vpow2.f32 %v447_v42  ;;  %v492_v18 = vsub.f32 0.0, %v490_v1  ;;  %v493_v20 = vmul.f32 1.442695, %v491_v12 }
  0x51   :  { %v305_v17 = vmul.f32 %v303_v52, %v996_v8  ;;  %v499_v11 = vand.u32 2147483647, %v729_v59  ;;  %v500_v25 = vand.u32 2147483647, %v730_v16  ;;  %v353_v29 = vmul.f32 %v351_v33, %v347_v22 }
  0x52   :  { %v306_v19 = vmul.f32 %v304_v13, %v998_v9  ;;  %v801_v23 = vpop.eup %800  ;;  %v495_v24 = vmul.f32 1.442695, %v492_v18  ;;  %v354_v8 = vmul.f32 %v352_v60, %v348_v48  ;;  %v395_v36 = vadd.f32 1.0, %v393_v62 }
  0x53   :  { %v803_v27 = vpop.eup %802  ;;  %v357_v53 = vmul.f32 %v801_v23, %v345_v32  ;;  %v396_v9 = vadd.f32 1.0, %v394_v2  ;;  %v1039_v37 = vadd.f32 -127.5, %v884_v3  ;;  %816 = vpow2.f32 %v493_v20 }
  0x54   :  { %v307_v28 = vadd.f32 %v306_v19, %v305_v17  ;;  %v805_v26 = vpop.eup %804  ;;  %v358_v31 = vmul.f32 %v803_v27, %v346_v39  ;;  %v501_v30 = vsub.f32 0.0, %v499_v11  ;;  %818 = vpow2.f32 %v495_v24 }
  0x55   :  { %v807_v10 = vpop.eup %806  ;;  %v359_v63 = vsub.f32 2.0, %v357_v53  ;;  %v397_v21 = vadd.f32 1808.043, %v805_v26  ;;  %v502_v14 = vsub.f32 0.0, %v500_v25  ;;  %v407_v33 = vmul.f32 %v805_v26, %v1017_v38 }
  0x56   :  { %308 = vadd.xlane.f32.xlu1 %v307_v28  ;;  %v1041_v41 = vpop.eup %808  ;;  %v360_v61 = vsub.f32 2.0, %v358_v31  ;;  %v398_v22 = vadd.f32 1808.043, %v807_v10  ;;  %v408_v34 = vmul.f32 %v807_v10, %v1023_v51  ;;  %v405_v15 = vsub.f32 %v1017_v38, %v805_v26 }
  0x57   :  { %v1043_v5 = vpop.eup %810  ;;  %v361_v48 = vmul.f32 %v801_v23, %v359_v63  ;;  %v399_v32 = vmul.f32 %v805_v26, %v397_v21  ;;  %v449_v39 = vadd.f32 1808.043, %v1041_v41  ;;  %v406_v54 = vsub.f32 %v1023_v51, %v807_v10 }
  0x58   :  { %v362_v40 = vmul.f32 %v803_v27, %v360_v61  ;;  %v400_v43 = vmul.f32 %v807_v10, %v398_v22  ;;  %v450_v35 = vadd.f32 1808.043, %v1043_v5  ;;  %v1049_v44 = vpop.eup %812  ;;  %v409_v56 = vsub.f32 1.0, %v407_v33 }
  0x59   :  { %v363_v49 = vmul.f32 %v361_v48, %v353_v29  ;;  %v401_v0 = vadd.f32 1.0, %v399_v32  ;;  %v451_v46 = vmul.f32 %v1041_v41, %v449_v39  ;;  %v455_v57 = vadd.f32 1808.043, %v1049_v44 }
  0x5a   :  { %v1053_v50 = vpop.eup %814  ;;  %v364_v45 = vmul.f32 %v362_v40, %v354_v8  ;;  %v402_v47 = vadd.f32 1.0, %v400_v43  ;;  %v452_v55 = vmul.f32 %v1043_v5, %v450_v35  ;;  %v410_v62 = vsub.f32 1.0, %v408_v34 }
  0x5b   :  { %v403_v60 = vmul.f32 %v401_v0, %v395_v36  ;;  %v456_v58 = vadd.f32 1808.043, %v1053_v50  ;;  %v453_v38 = vadd.f32 1.0, %v451_v46  ;;  %v457_v12 = vmul.f32 %v1049_v44, %v455_v57 }
  0x5c   :  { %v365_v42 = vadd.f32 %v364_v45, %v363_v49  ;;  %v404_v52 = vmul.f32 %v402_v47, %v396_v9  ;;  %v454_v1 = vadd.f32 1.0, %v452_v55  ;;  %v503_v51 = vmul.f32 1.442695, %v501_v30 }
  0x5d   :  { %820 = vrcp.f32 %v403_v60  ;;  %v458_v13 = vmul.f32 %v1053_v50, %v456_v58  ;;  %v732_v59 = vadd.f32 -127.5, %v886_v4  ;;  %v1062_v16 = vpop.eup %816  ;;  %v459_v17 = vadd.f32 1.0, %v457_v12 }
  0x5e   :  { %366 = vadd.xlane.f32.xlu0 %v365_v42  ;;  %822 = vrcp.f32 %v404_v52  ;;  %v505_v18 = vmul.f32 1.442695, %v502_v14  ;;  %v547_v19 = vand.u32 2147483647, %v1039_v37  ;;  %v1065_v20 = vpop.eup %818  ;;  %v411_v11 = vmul.f32 %v409_v56, %v405_v15 }
  0x5f   :  { %v460_v2 = vadd.f32 1.0, %v458_v13  ;;  %v465_v23 = vmul.f32 %v1049_v44, %v1041_v41  ;;  %824 = vpow2.f32 %v503_v51  ;;  %v733_v24 = vadd.f32 -127.5, %v891_v6 }
  0x60   :  { %v412_v25 = vmul.f32 %v410_v62, %v406_v54  ;;  %v461_v27 = vmul.f32 %v459_v17, %v453_v38  ;;  %826 = vpow2.f32 %v505_v18  ;;  %v463_v29 = vsub.f32 %v1041_v41, %v1049_v44 }
  0x61   :  { %v462_v28 = vmul.f32 %v460_v2, %v454_v1  ;;  %v464_v8 = vsub.f32 %v1043_v5, %v1053_v50  ;;  %v466_v53 = vmul.f32 %v1053_v50, %v1043_v5  ;;  %v548_v26 = vand.u32 2147483647, %v732_v59 }
  0x62   :  { %828 = vrcp.f32 %v461_v27  ;;  %v507_v31 = vadd.f32 1808.043, %v1062_v16  ;;  %v549_v36 = vsub.f32 0.0, %v547_v19  ;;  %v734_v9 = vadd.f32 -127.5, %v893_v7 }
  0x63   :  { %v467_v37 = vsub.f32 1.0, %v465_v23  ;;  %830 = vrcp.f32 %v462_v28  ;;  %v550_v10 = vsub.f32 0.0, %v548_v26  ;;  %v557_v63 = vand.u32 2147483647, %v733_v24 }
  0x64   :  { %v551_v21 = vmul.f32 1.442695, %v549_v36  ;;  %v558_v30 = vand.u32 2147483647, %v734_v9  ;;  %v735_v41 = vadd.f32 -142.5, %v884_v3  ;;  %v736_v61 = vadd.f32 -142.5, %v886_v4 }
  0x65   :  { %v468_v22 = vsub.f32 1.0, %v466_v53  ;;  %v508_v14 = vadd.f32 1808.043, %v1065_v20  ;;  %v553_v5 = vmul.f32 1.442695, %v550_v10  ;;  %v559_v48 = vsub.f32 0.0, %v557_v63 }
  0x66   :  { %v509_v33 = vmul.f32 %v1062_v16, %v507_v31  ;;  %832 = vpow2.f32 %v551_v21  ;;  %v560_v39 = vsub.f32 0.0, %v558_v30  ;;  %v737_v40 = vadd.f32 -142.5, %v891_v6 }
  0x67   :  { %v821_v32 = vpop.eup %820  ;;  %834 = vpow2.f32 %v553_v5  ;;  %v561_v35 = vmul.f32 1.442695, %v559_v48  ;;  %v605_v44 = vand.u32 2147483647, %v735_v41  ;;  %v469_v49 = vmul.f32 %v467_v37, %v463_v29 }
  0x68   :  { %v823_v43 = vpop.eup %822  ;;  %v415_v34 = vmul.f32 %v821_v32, %v403_v60  ;;  %v563_v4 = vmul.f32 1.442695, %v560_v39  ;;  %v606_v0 = vand.u32 2147483647, %v736_v61  ;;  %v470_v50 = vmul.f32 %v468_v22, %v464_v8 }
  0x69   :  { %v416_v3 = vmul.f32 %v823_v43, %v404_v52  ;;  %v1083_v15 = vpop.eup %824  ;;  %v510_v45 = vmul.f32 %v1065_v20, %v508_v14  ;;  %836 = vpow2.f32 %v561_v35  ;;  %v511_v6 = vadd.f32 1.0, %v509_v33 }
  0x6a   :  { %v417_v46 = vsub.f32 2.0, %v415_v34  ;;  %v1086_v47 = vpop.eup %826  ;;  %v513_v55 = vadd.f32 1808.043, %v1083_v15  ;;  %v738_v60 = vadd.f32 -142.5, %v893_v7  ;;  %v607_v58 = vsub.f32 0.0, %v605_v44 }
  0x6b   :  { %v418_v54 = vsub.f32 2.0, %v416_v3  ;;  %v514_v57 = vadd.f32 1808.043, %v1086_v47  ;;  %v615_v42 = vand.u32 2147483647, %v737_v40  ;;  %838 = vpow2.f32 %v563_v4 }
  0x6c   :  { %v419_v56 = vmul.f32 %v821_v32, %v417_v46  ;;  %v829_v52 = vpop.eup %828  ;;  %v515_v38 = vmul.f32 %v1083_v15, %v513_v55  ;;  %v608_v1 = vsub.f32 0.0, %v606_v0  ;;  %v512_v59 = vadd.f32 1.0, %v510_v45 }
  0x6d   :  { %v420_v62 = vmul.f32 %v823_v43, %v418_v54  ;;  %v831_v12 = vpop.eup %830  ;;  %v473_v51 = vmul.f32 %v829_v52, %v461_v27  ;;  %v516_v17 = vmul.f32 %v1086_v47, %v514_v57  ;;  %v616_v19 = vand.u32 2147483647, %v738_v60 }
  0x6e   :  { %v421_v13 = vmul.f32 %v419_v56, %v411_v11  ;;  %v474_v18 = vmul.f32 %v831_v12, %v462_v28  ;;  %v517_v7 = vadd.f32 1.0, %v515_v38  ;;  %v609_v29 = vmul.f32 1.442695, %v607_v58 }
  0x6f   :  { %v422_v2 = vmul.f32 %v420_v62, %v412_v25  ;;  %v475_v23 = vsub.f32 2.0, %v473_v51  ;;  %v518_v24 = vadd.f32 1.0, %v516_v17  ;;  %v617_v8 = vsub.f32 0.0, %v615_v42 }
  0x70   :  { %v1093_v53 = vpop.eup %832  ;;  %v476_v31 = vsub.f32 2.0, %v474_v18  ;;  %v519_v36 = vmul.f32 %v517_v7, %v511_v6  ;;  %v611_v9 = vmul.f32 1.442695, %v608_v1  ;;  %840 = vpow2.f32 %v609_v29 }
  0x71   :  { %v423_v26 = vadd.f32 %v422_v2, %v421_v13  ;;  %v1095_v37 = vpop.eup %834  ;;  %v477_v11 = vmul.f32 %v829_v52, %v475_v23  ;;  %v520_v27 = vmul.f32 %v518_v24, %v512_v59  ;;  %v565_v10 = vadd.f32 1808.043, %v1093_v53 }
  0x72   :  { %v478_v25 = vmul.f32 %v831_v12, %v476_v31  ;;  %842 = vrcp.f32 %v519_v36  ;;  %v566_v28 = vadd.f32 1808.043, %v1095_v37  ;;  %v618_v63 = vsub.f32 0.0, %v616_v19 }
  0x73   :  { %424 = vadd.xlane.f32.xlu1 %v423_v26  ;;  %v1099_v21 = vpop.eup %836  ;;  %v479_v30 = vmul.f32 %v477_v11, %v469_v49  ;;  %844 = vrcp.f32 %v520_v27  ;;  %v567_v41 = vmul.f32 %v1093_v53, %v565_v10  ;;  %v619_v61 = vmul.f32 1.442695, %v617_v8 }
  0x74   :  { %v480_v22 = vmul.f32 %v478_v25, %v470_v50  ;;  %v571_v14 = vadd.f32 1808.043, %v1099_v21  ;;  %v568_v5 = vmul.f32 %v1095_v37, %v566_v28  ;;  %846 = vpow2.f32 %v611_v9 }
  0x75   :  { %v621_v48 = vmul.f32 1.442695, %v618_v63  ;;  %v1104_v32 = vpop.eup %838  ;;  %v569_v39 = vadd.f32 1.0, %v567_v41  ;;  %848 = vpow2.f32 %v619_v61  ;;  %v523_v43 = vmul.f32 %v1083_v15, %v1062_v16 }
  0x76   :  { %v481_v33 = vadd.f32 %v480_v22, %v479_v30  ;;  %v573_v40 = vmul.f32 %v1099_v21, %v571_v14  ;;  %v572_v34 = vadd.f32 1808.043, %v1104_v32  ;;  %v524_v35 = vmul.f32 %v1086_v47, %v1065_v20 }
  0x77   :  { %850 = vpow2.f32 %v621_v48  ;;  %v570_v3 = vadd.f32 1.0, %v568_v5  ;;  %v521_v46 = vsub.f32 %v1062_v16, %v1083_v15  ;;  %v525_v50 = vsub.f32 1.0, %v523_v43 }
  0x78   :  { %482 = vadd.xlane.f32.xlu0 %v481_v33  ;;  %v575_v44 = vadd.f32 1.0, %v573_v40  ;;  %v574_v49 = vmul.f32 %v1104_v32, %v572_v34  ;;  %v522_v6 = vsub.f32 %v1065_v20, %v1086_v47  ;;  %v526_v55 = vsub.f32 1.0, %v524_v35 }
  0x79   :  { %v527_v62 = vmul.f32 %v525_v50, %v521_v46  ;;  %v581_v17 = vmul.f32 %v1099_v21, %v1093_v53  ;;  %v582_v29 = vmul.f32 %v1104_v32, %v1095_v37  ;;  %v579_v11 = vsub.f32 %v1093_v53, %v1099_v21 }
  0x7a   :  { %v577_v4 = vmul.f32 %v575_v44, %v569_v39  ;;  %v1113_v0 = vpop.eup %840  ;;  %v576_v45 = vadd.f32 1.0, %v574_v49  ;;  %v528_v1 = vmul.f32 %v526_v55, %v522_v6  ;;  %v580_v63 = vsub.f32 %v1095_v37, %v1104_v32 }
  0x7b   :  { %v623_v60 = vadd.f32 1808.043, %v1113_v0  ;;  %v584_v30 = vsub.f32 1.0, %v582_v29 }
  0x7c   :  { %v843_v54 = vpop.eup %842  ;;  %852 = vrcp.f32 %v577_v4  ;;  %v578_v58 = vmul.f32 %v576_v45, %v570_v3 }
  0x7d   :  { %v845_v56 = vpop.eup %844  ;;  %v531_v57 = vmul.f32 %v843_v54, %v519_v36  ;;  %v625_v16 = vmul.f32 %v1113_v0, %v623_v60  ;;  %v586_v33 = vmul.f32 %v584_v30, %v580_v63 }
  0x7e   :  { %v532_v42 = vmul.f32 %v845_v56, %v520_v27  ;;  %v847_v52 = vpop.eup %846  ;;  %854 = vrcp.f32 %v578_v58  ;;  %v583_v27 = vsub.f32 1.0, %v581_v17 }
  0x7f   :  { %v533_v38 = vsub.f32 2.0, %v531_v57  ;;  %v849_v15 = vpop.eup %848  ;;  %v624_v13 = vadd.f32 1808.043, %v847_v52  ;;  %v627_v7 = vadd.f32 1.0, %v625_v16 }
  0x80   :  { %v534_v12 = vsub.f32 2.0, %v532_v42  ;;  %v629_v20 = vadd.f32 1808.043, %v849_v15  ;;  %v585_v14 = vmul.f32 %v583_v27, %v579_v11  ;;  %v639_v40 = vmul.f32 %v849_v15, %v1113_v0 }
  0x81   :  { %v535_v51 = vmul.f32 %v843_v54, %v533_v38  ;;  %v851_v47 = vpop.eup %850  ;;  %v626_v2 = vmul.f32 %v847_v52, %v624_v13  ;;  %v637_v37 = vsub.f32 %v1113_v0, %v849_v15 }
  0x82   :  { %v536_v59 = vmul.f32 %v845_v56, %v534_v12  ;;  %v630_v19 = vadd.f32 1808.043, %v851_v47  ;;  %v631_v23 = vmul.f32 %v849_v15, %v629_v20  ;;  %v640_v34 = vmul.f32 %v851_v47, %v847_v52 }
  0x83   :  { %v537_v18 = vmul.f32 %v535_v51, %v527_v62  ;;  %v628_v8 = vadd.f32 1.0, %v626_v2  ;;  %v641_v32 = vsub.f32 1.0, %v639_v40  ;;  %v638_v3 = vsub.f32 %v847_v52, %v851_v47 }
  0x84   :  { %v538_v24 = vmul.f32 %v536_v59, %v528_v1  ;;  %v632_v26 = vmul.f32 %v851_v47, %v630_v19  ;;  %v633_v31 = vadd.f32 1.0, %v631_v23  ;;  %v642_v49 = vsub.f32 1.0, %v640_v34 }
  0x85   :  { %v643_v50 = vmul.f32 %v641_v32, %v637_v37  ;;  %v79_v62 = vlaneseq }
  0x86   :  { %v853_v36 = vpop.eup %852  ;;  %v539_v9 = vadd.f32 %v538_v24, %v537_v18  ;;  %v634_v25 = vadd.f32 1.0, %v632_v26  ;;  %v635_v28 = vmul.f32 %v633_v31, %v627_v7  ;;  %v644_v6 = vmul.f32 %v642_v49, %v638_v3 }
  0x87   :  { %v589_v10 = vmul.f32 %v853_v36, %v577_v4  ;;  %v80_v38 = vand.u32 127, %v79_v62 }
  0x88   :  { %540 = vadd.xlane.f32.xlu1 %v539_v9  ;;  %v855_v41 = vpop.eup %854  ;;  %v636_v22 = vmul.f32 %v634_v25, %v628_v8  ;;  %856 = vrcp.f32 %v635_v28 }
  0x89   :  { %v591_v61 = vsub.f32 2.0, %v589_v10  ;;  %v590_v5 = vmul.f32 %v855_v41, %v578_v58  ;;  %vm194_vm0 = vcmp.eq.s32.totalorder %v80_v38, 1  ;;  %vm136_vm1 = vcmp.eq.s32.totalorder %v80_v38, 0 }
  0x8a   :  { %858 = vrcp.f32 %v636_v22  ;;  %vm252_vm2 = vcmp.eq.s32.totalorder %v80_v38, 2  ;;  %vm310_vm3 = vcmp.eq.s32.totalorder %v80_v38, 3  ;;  %vm368_vm4 = vcmp.eq.s32.totalorder %v80_v38, 4 }
  0x8b   :  { %v593_v48 = vmul.f32 %v853_v36, %v591_v61  ;;  %v592_v39 = vsub.f32 2.0, %v590_v5  ;;  %vm426_vm5 = vcmp.eq.s32.totalorder %v80_v38, 5  ;;  %vm484_vm6 = vcmp.eq.s32.totalorder %v80_v38, 6 }
  0x8c   :  { %vm542_vm7 = vcmp.eq.s32.totalorder %v80_v38, 7  ;;  %vm600_vm8 = vcmp.eq.s32.totalorder %v80_v38, 8  ;;  %vm658_vm9 = vcmp.eq.s32.totalorder %v80_v38, 9 }
  0x8d   :  { %v594_v53 = vmul.f32 %v855_v41, %v592_v39  ;;  %v595_v21 = vmul.f32 %v593_v48, %v585_v14 }
  0x8f   :  { %v596_v43 = vmul.f32 %v594_v53, %v586_v33 }
  0x91   :  { %v597_v35 = vadd.f32 %v596_v43, %v595_v21 }
  0x92   :  { %v857_v44 = vpop.eup %856 }
  0x93   :  { %598 = vadd.xlane.f32.xlu0 %v597_v35  ;;  %v647_v4 = vmul.f32 %v857_v44, %v635_v28 }
  0x94   :  { %v859_v46 = vpop.eup %858 }
  0x95   :  { %v648_v45 = vmul.f32 %v859_v46, %v636_v22  ;;  %v649_v54 = vsub.f32 2.0, %v647_v4 }
  0x97   :  { %v650_v55 = vsub.f32 2.0, %v648_v45  ;;  %v651_v60 = vmul.f32 %v857_v44, %v649_v54 }
  0x99   :  { %v652_v56 = vmul.f32 %v859_v46, %v650_v55  ;;  %v653_v57 = vmul.f32 %v651_v60, %v643_v50 }
  0x9b   :  { %v654_v58 = vmul.f32 %v652_v56, %v644_v6 }
  0x9d   :  { %v655_v42 = vadd.f32 %v654_v58, %v653_v57 }
  0x9f   :  { %656 = vadd.xlane.f32.xlu1 %v655_v42 }
  0xc4   :  { %v135_v0 = vpop.xlane.xlu0 %134 }
  0xc5   :  { %v137_v1 = vsel %vm136_vm1, %v135_v0, 0.0 }
  0xc8   :  { %v251_v52 = vpop.xlane.xlu1 %250 }
  0xc9   :  { %v253_v51 = vsel %vm252_vm2, %v251_v52, 0.0 }
  0xce   :  { %v193_v16 = vpop.xlane.xlu0 %192 }
  0xcf   :  { %v195_v15 = vsel %vm194_vm0, %v193_v16, 0.0 }
  0xd0   :  { %v196_v12 = vadd.f32 %v195_v15, %v137_v1 }
  0xd2   :  { %v254_v20 = vadd.f32 %v253_v51, %v196_v12 }
  0xe3   :  { %v309_v13 = vpop.xlane.xlu1 %308 }
  0xe4   :  { %v311_v47 = vsel %vm310_vm3, %v309_v13, 0.0 }
  0xe5   :  { %v312_v17 = vadd.f32 %v311_v47, %v254_v20 }
  0xeb   :  { %v367_v59 = vpop.xlane.xlu0 %366 }
  0xec   :  { %v369_v2 = vsel %vm368_vm4, %v367_v59, 0.0 }
  0xed   :  { %v370_v7 = vadd.f32 %v369_v2, %v312_v17 }
 0x100   :  { %v425_v18 = vpop.xlane.xlu1 %424 }
 0x101   :  { %v427_v19 = vsel %vm426_vm5, %v425_v18, 0.0 }
 0x102   :  { %v428_v24 = vadd.f32 %v427_v19, %v370_v7 }
 0x105   :  { %v483_v23 = vpop.xlane.xlu0 %482 }
 0x106   :  { %v485_v29 = vsel %vm484_vm6, %v483_v23, 0.0 }
 0x107   :  { %v486_v26 = vadd.f32 %v485_v29, %v428_v24 }
 0x115   :  { %v541_v8 = vpop.xlane.xlu1 %540 }
 0x116   :  { %v543_v31 = vsel %vm542_vm7, %v541_v8, 0.0 }
 0x117   :  { %v544_v9 = vadd.f32 %v543_v31, %v486_v26 }
 0x120   :  { %v599_v36 = vpop.xlane.xlu0 %598 }
 0x121   :  { %v601_v11 = vsel %vm600_vm8, %v599_v36, 0.0 }
 0x122   :  { %v602_v27 = vadd.f32 %v601_v11, %v544_v9 }
 0x12c   :  { %v657_v10 = vpop.xlane.xlu1 %656 }
 0x12d   :  { %v659_v25 = vsel %vm658_vm9, %v657_v10, 0.0 }
 0x12e   :  { %v660_v28 = vadd.f32 %v659_v25, %v602_v27 }
 0x130   :  { %663 = vst [vmem:[%s1136_s2] sm:$0xff] %v660_v28 }

</bundles_post_ra>
